<compile_context>
chip_gen: v5e
topology: v5e:2x2
jax: 0.10.0
libtpu: 0.0.40
codegen_flags: <defaults>
</compile_context>

<pallas_src>
import jax
import jax.numpy as jnp
from jax.experimental import pallas as pl
from jax.experimental.pallas import tpu as pltpu


def _round_up(a, b):
    return ((a + b - 1) // b) * b


def _vmem_capacity_bytes():
    """Physical VMEM per TensorCore; falls back to the smallest part (v7x, 64 MiB)."""
    try:
        info = pltpu.get_tpu_info()
        for attr in ("vmem_capacity_bytes", "vmem_size_bytes", "vmem_bytes"):
            v = getattr(info, attr, None)
            if v:
                return int(v)
    except Exception:
        pass
    return 64 * 1024 * 1024


def _pick_tile(dim_p, cap):
    for t in (1024, 512, 256, 128):
        if t <= cap and dim_p % t == 0:
            return t
    return dim_p


def _make_gmm_kernel(single_k):
    """Grouped expert matmul with dead-tile predication via scalar prefetch."""
    if single_k:
        def kernel(te_ref, nv_ref, x_ref, w_ref, o_ref):
            del te_ref  # only used by the index_maps

            @pl.when(pl.program_id(1) < nv_ref[0])
            def _():
                o_ref[...] = jnp.dot(
                    x_ref[...], w_ref[0],
                    preferred_element_type=jnp.float32).astype(o_ref.dtype)
        return kernel

    def kernel(te_ref, nv_ref, x_ref, w_ref, o_ref, acc_ref):
        del te_ref
        k = pl.program_id(2)

        @pl.when(pl.program_id(1) < nv_ref[0])
        def _():
            @pl.when(k == 0)
            def _():
                acc_ref[...] = jnp.zeros_like(acc_ref)

            acc_ref[...] += jnp.dot(x_ref[...], w_ref[0],
                                    preferred_element_type=jnp.float32)

            @pl.when(k == pl.num_programs(2) - 1)
            def _():
                o_ref[...] = acc_ref[...].astype(o_ref.dtype)
    return kernel


def moe_forward(x, gate_w, gate_b, expert_w, expert_b, *,
                tile_m=512, compute_dtype=jnp.bfloat16):
    """x: (batch, seq, Din) f32.  Returns (batch, seq, Dout) f32."""
    orig_shape = x.shape
    num_experts, dout, din = expert_w.shape

    x2 = x.reshape(-1, din).astype(jnp.float32)
    n_tokens = x2.shape[0]

    # ---- 1) Routing (gate) in f32.  softmax folded away (monotone under argmax).
    logits = x2 @ gate_w.T.astype(jnp.float32) + gate_b.astype(jnp.float32)
    sel = jnp.argmax(logits, axis=-1).astype(jnp.int32)                 # (N,)

    # ---- 2) Dispatch: group tokens by expert into tile_m-aligned buckets.
    onehot = (sel[:, None] ==
              jnp.arange(num_experts, dtype=jnp.int32)[None, :]).astype(jnp.int32)
    counts = onehot.sum(axis=0)                                         # (E,)
    rank = jnp.take_along_axis(jnp.cumsum(onehot, axis=0),
                               sel[:, None], axis=1)[:, 0] - 1          # (N,)
    padded = ((counts + tile_m - 1) // tile_m) * tile_m                 # (E,)
    cum_padded = jnp.cumsum(padded)                                     # (E,)
    offsets = cum_padded - padded                                       # (E,)
    dest = offsets[sel] + rank                                          # (N,)

    # Static upper bound on dispatched rows; only `num_valid` M tiles are real.
    rows = _round_up(n_tokens, tile_m) + num_experts * tile_m
    num_m_tiles = rows // tile_m
    num_valid = (cum_padded[-1] // tile_m).astype(jnp.int32).reshape((1,))

    # Per-tile expert owner (scalar-prefetched into SMEM for the index_maps).
    tile_start = jnp.arange(num_m_tiles, dtype=jnp.int32) * tile_m
    tile_expert = jnp.minimum(
        jnp.searchsorted(cum_padded, tile_start, side="right"),
        num_experts - 1).astype(jnp.int32)

    # Generation-aware tiling: pad to 256 multiples (keeps the 256x256 MXU full),
    # size tiles from physical VMEM (v7x 64 MiB -> 512 caps; 128 MiB parts -> 1024).
    vmem_cap = _vmem_capacity_bytes()
    big_vmem = vmem_cap >= 100 * 1024 * 1024
    din_p = _round_up(din, 256)
    dout_p = _round_up(dout, 256)
    tile_n = _pick_tile(dout_p, 1024 if big_vmem else 512)
    max_full_k = 2048 if big_vmem else 1024
    tile_k = din_p if din_p <= max_full_k else _pick_tile(
        din_p, 1024 if big_vmem else 512)
    num_k_tiles = din_p // tile_k
    num_n_tiles = dout_p // tile_n
    single_k = num_k_tiles == 1

    # bf16 operands, f32 accumulation (mirrors the module's autocast compute).
    xp = jnp.pad(x2, ((0, 0), (0, din_p - din)))
    xd = jnp.zeros((rows, din_p), compute_dtype).at[dest].set(
        xp.astype(compute_dtype))
    # TODO(synk): dispatch could be fused into the kernel (manual DMA row-gather
    #             from an ANY-space x) to avoid this extra HBM round-trip.

    ew = jnp.transpose(expert_w, (0, 2, 1))                             # (E, Din, Dout)
    ew = jnp.pad(ew, ((0, 0), (0, din_p - din), (0, dout_p - dout)))
    ew = ew.astype(compute_dtype)

    # Grid (n, m, k): for a fixed n, consecutive M tiles owned by the SAME expert
    # keep an identical weight block index, so the pipeline skips the weight
    # re-fetch.  Dead tiles (m >= num_valid) pin all input blocks to block 0
    # (no new DMAs) and do no compute.
    grid = (num_n_tiles, num_m_tiles, num_k_tiles)

    def x_map(n, m, k, te, nv):
        v = (m < nv[0]).astype(jnp.int32)
        return (m * v, k * v)

    def w_map(n, m, k, te, nv):
        v = (m < nv[0]).astype(jnp.int32)
        return (te[m] * v, k * v, n * v)

    def o_map(n, m, k, te, nv):
        return (m, n)

    scratch = [] if single_k else [pltpu.VMEM((tile_m, tile_n), jnp.float32)]

    # VMEM budget (double-buffered blocks + accumulator) with headroom below the
    # physical per-core capacity (75% -> ~48 MiB on v7x, ~96 MiB on 128 MiB parts).
    blk_bytes = (2 * tile_m * tile_k * 2          # x (bf16)
                 + 2 * tile_k * tile_n * 2        # w (bf16)
                 + 2 * tile_m * tile_n * 2        # out (bf16)
                 + (0 if single_k else tile_m * tile_n * 4))  # f32 accumulator
    vmem_limit = int(min(max(4 * blk_bytes, 32 * 1024 * 1024),
                         int(0.75 * vmem_cap)))

    flops = 2 * rows * din_p * dout_p
    bytes_accessed = (num_n_tiles * rows * din_p * 2          # x refetched per n tile
                      + num_m_tiles * din_p * dout_p * 2      # weights (no-reuse bound)
                      + rows * dout_p * 2)                    # bf16 output

    out_padded = pl.pallas_call(
        _make_gmm_kernel(single_k),
        out_shape=jax.ShapeDtypeStruct((rows, dout_p), compute_dtype),
        grid_spec=pltpu.PrefetchScalarGridSpec(
            num_scalar_prefetch=2,
            grid=grid,
            in_specs=[
                pl.BlockSpec((tile_m, tile_k), x_map),
                pl.BlockSpec((1, tile_k, tile_n), w_map),
            ],
            out_specs=pl.BlockSpec((tile_m, tile_n), o_map),
            scratch_shapes=scratch,
        ),
        compiler_params=pltpu.CompilerParams(
            dimension_semantics=("parallel", "parallel", "arbitrary"),
            vmem_limit_bytes=vmem_limit,
        ),
        cost_estimate=pl.CostEstimate(flops=flops, transcendentals=0,
                                      bytes_accessed=bytes_accessed),
    )(tile_expert, num_valid, xd, ew)

    # ---- 3) Combine: gather expert outputs back to original token positions.
    #         Per-expert bias added here (out of the per-k pipeline), in f32.
    y = out_padded[dest][:, :dout].astype(jnp.float32)
    y = y + expert_b[sel].astype(jnp.float32)
    return y.reshape(*orig_shape[:-1], dout)


def moe_reference(x, gate_w, gate_b, expert_w, expert_b, *,
                  compute_dtype=jnp.bfloat16):
    """Plain-JAX reference (same bf16-operand / f32-accumulate / bf16-output math)."""
    orig_shape = x.shape
    num_experts, dout, din = expert_w.shape
    x2 = x.reshape(-1, din).astype(jnp.float32)
    logits = x2 @ gate_w.T.astype(jnp.float32) + gate_b.astype(jnp.float32)
    gates = jax.nn.softmax(logits, axis=-1)
    sel = jnp.argmax(gates, axis=-1)
    per_expert = jnp.einsum(
        "td,eod->teo", x2.astype(compute_dtype), expert_w.astype(compute_dtype),
        preferred_element_type=jnp.float32)
    # Mirror the kernel's bf16 output precision before the f32 bias add.
    per_expert = per_expert.astype(compute_dtype).astype(jnp.float32)
    per_expert = per_expert + expert_b[None, :, :].astype(jnp.float32)
    y = jnp.take_along_axis(per_expert, sel[:, None, None], axis=1)[:, 0, :]
    return y.reshape(*orig_shape[:-1], dout)


if __name__ == "__main__":
    # Small, forward-consistent shapes (kept modest; kernel scales by design).
    batch, seq = 4, 128
    input_size, output_size = 256, 256
    num_experts = 8
    # world_size=1, rank=0: all_reduce / all_to_all_single are identities.

    key = jax.random.PRNGKey(0)
    k_x, k_gw, k_gb, k_ew, k_eb = jax.random.split(key, 5)

    x = jax.random.normal(k_x, (batch, seq, input_size), jnp.float32)

    # Deterministic parameter init (nn.Linear-style scale).
    bound = 1.0 / (input_size ** 0.5)
    gate_w = jax.random.uniform(
        k_gw, (num_experts, input_size), jnp.float32, -bound, bound)
    gate_b = jax.random.uniform(
        k_gb, (num_experts,), jnp.float32, -bound, bound)
    expert_w = jax.random.uniform(
        k_ew, (num_experts, output_size, input_size), jnp.float32, -bound, bound)
    expert_b = jax.random.uniform(
        k_eb, (num_experts, output_size), jnp.float32, -bound, bound)

    fwd = jax.jit(moe_forward)
    out = jax.block_until_ready(fwd(x, gate_w, gate_b, expert_w, expert_b))

    ref = moe_reference(x, gate_w, gate_b, expert_w, expert_b)
    assert out.shape == (batch, seq, output_size)
    # Both paths round the expert matmul to bf16; allow ~1 bf16 ulp of slack.
    assert jnp.allclose(out, ref, atol=1e-3, rtol=1e-2), "mismatch vs reference"

    print("KERNEL_OK")
</pallas_src>

<mosaic_0001>
module attributes {stable_mosaic.version = 11 : i64} {
  func.func @kernel(%arg0: i32, %arg1: i32, %arg2: i32, %arg3: memref<9xi32, #tpu.memory_space<smem>>, %arg4: memref<1xi32, #tpu.memory_space<smem>>, %arg5: memref<512x256xbf16, #tpu.memory_space<vmem>>, %arg6: memref<1x256x256xbf16, #tpu.memory_space<vmem>>, %arg7: memref<512x256xbf16, #tpu.memory_space<vmem>>) attributes {dimension_semantics = [#tpu.dimension_semantics<parallel>, #tpu.dimension_semantics<parallel>, #tpu.dimension_semantics<arbitrary>], iteration_bounds = array<i64: 1, 9, 1>, scalar_prefetch = 2 : i64, scratch_operands = 0 : i64, tpu.core_type = #tpu.core_type<tc>, window_params = [{transform_indices = @transform_0, window_bounds = array<i64: 512, 256>}, {transform_indices = @transform_1, window_bounds = array<i64: 1, 256, 256>}, {transform_indices = @transform_2, window_bounds = array<i64: 512, 256>}]} {
    %c0 = arith.constant 0 : index
    %0 = memref.load %arg4[%c0] : memref<1xi32, #tpu.memory_space<smem>>
    %1 = arith.cmpi slt, %arg1, %0 : i32
    %2 = arith.extui %1 : i1 to i32
    %c0_i32 = arith.constant 0 : i32
    %3 = arith.cmpi ne, %2, %c0_i32 : i32
    scf.if %3 {
      %c0_0 = arith.constant 0 : index
      %c0_1 = arith.constant 0 : index
      %4 = vector.load %arg5[%c0_0, %c0_1] : memref<512x256xbf16, #tpu.memory_space<vmem>>, vector<512x256xbf16>
      %c0_2 = arith.constant 0 : index
      %c0_3 = arith.constant 0 : index
      %c0_4 = arith.constant 0 : index
      %5 = vector.load %arg6[%c0_2, %c0_3, %c0_4] : memref<1x256x256xbf16, #tpu.memory_space<vmem>>, vector<1x256x256xbf16>
      %6 = vector.shape_cast %5 : vector<1x256x256xbf16> to vector<256x256xbf16>
      %cst = arith.constant dense<0.000000e+00> : vector<512x256xf32>
      %7 = tpu.matmul %4, %6, %cst {dimension_numbers = #tpu.dot_dimension_numbers<[1], [0], [0], [1], [0, 0, 1, 1], [], []>} : vector<512x256xbf16>, vector<256x256xbf16>, vector<512x256xf32> -> vector<512x256xf32>
      %8 = arith.truncf %7 : vector<512x256xf32> to vector<512x256xbf16>
      %c0_5 = arith.constant 0 : index
      %c0_6 = arith.constant 0 : index
      %9 = vector.load %arg7[%c0_5, %c0_6] : memref<512x256xbf16, #tpu.memory_space<vmem>>, vector<512x256xbf16>
      tpu.vector_store %arg7[%c0_5, %c0_6], %8 {strides = array<i32>} : memref<512x256xbf16, #tpu.memory_space<vmem>>, vector<512x256xbf16>,
    } else {
    }
    return
  }
  func.func @transform_0(%arg0: i32, %arg1: i32, %arg2: i32, %arg3: memref<9xi32, #tpu.memory_space<smem>>, %arg4: memref<1xi32, #tpu.memory_space<smem>>) -> (i32, i32) {
    %c0 = arith.constant 0 : index
    %0 = memref.load %arg4[%c0] : memref<1xi32, #tpu.memory_space<smem>>
    %1 = arith.cmpi slt, %arg1, %0 : i32
    %2 = arith.extui %1 : i1 to i32
    %3 = arith.muli %arg1, %2 : i32
    %4 = arith.muli %arg2, %2 : i32
    %c0_i32 = arith.constant 0 : i32
    return %3, %4 : i32, i32
  }
  func.func @transform_1(%arg0: i32, %arg1: i32, %arg2: i32, %arg3: memref<9xi32, #tpu.memory_space<smem>>, %arg4: memref<1xi32, #tpu.memory_space<smem>>) -> (i32, i32, i32) {
    %c0 = arith.constant 0 : index
    %0 = memref.load %arg4[%c0] : memref<1xi32, #tpu.memory_space<smem>>
    %1 = arith.cmpi slt, %arg1, %0 : i32
    %2 = arith.extui %1 : i1 to i32
    %3 = arith.index_cast %arg1 : i32 to index
    %4 = memref.load %arg3[%3] : memref<9xi32, #tpu.memory_space<smem>>
    %5 = arith.muli %4, %2 : i32
    %6 = arith.muli %arg2, %2 : i32
    %7 = arith.muli %arg0, %2 : i32
    %c0_i32 = arith.constant 0 : i32
    return %5, %6, %7 : i32, i32, i32
  }
  func.func @transform_2(%arg0: i32, %arg1: i32, %arg2: i32, %arg3: memref<9xi32, #tpu.memory_space<smem>>, %arg4: memref<1xi32, #tpu.memory_space<smem>>) -> (i32, i32) {
    %c0_i32 = arith.constant 0 : i32
    return %arg1, %arg0 : i32, i32
  }
}

</mosaic_0001>

<bundles_post_ra>
// kernel: custom-call.2
= control target key start
LH: loop header
LB: loop body
LE: loop exit
PB: predicated region body
PF: predicated region fallthrough
CT: control target
= control target key end

     0   :  { %s6_s0 = inlined_call_operand.vmem [shape: u32[9], index: 0, kind: output, shape index: {}]  }

// kernel: moe_forward.1
= control target key start
LH: loop header
LB: loop body
LE: loop exit
PB: predicated region body
PF: predicated region fallthrough
CT: control target
= control target key end

     0   :  { %s2412_s20 = smov [#allocation3]   ;;  %s2749_s0 = inlined_call_operand.vmem [shape: s32[9], index: 0, kind: input, shape index: {}]   ;;  %s2750_s1 = inlined_call_operand.<no memory space> [shape: s32[1], index: 1, kind: input, shape index: {}]   ;;  %s2751_s2 = inlined_call_operand.vmem [shape: bf16[4608,256], index: 2, kind: input, shape index: {}]   ;;  %s2752_s3 = inlined_call_operand.vmem [shape: bf16[8,256,256], index: 3, kind: input, shape index: {}]   ;;  %s2753_s4 = inlined_call_operand.vmem [shape: bf16[4608,256], index: 4, kind: output, shape index: {}]  }
   0x1   :  { %s10_s17 = sshll.u32 %s2749_s0, 4  ;;  %14 = sst [smem:[#allocation4]] %s2750_s1  ;;  %s11_s17 = int_to_ptr.vmem [resolvable:$true] %s10_s17 }
   0x2   :  { %13 = dma.vmem_to_smem %s11_s17, 16, %s2412_s20, [#allocation2] }
   0x3   :  { %2398 = dma.done.wait [#allocation2], 16 }
   0x4   :  { %2399 = vsyncadd [#allocation2], 4294967280 }
   0x5   :  { %17 = sfence }
   0x6   :  { %s2444_s21 = smov 0   ;;  %s2446_s22 = smov 0  }
   0x7   :  { %s2448_s23 = smov 0  }
   0x8 LB: > { %s38_s0 = sadd.s32 1, %s2406_s22  ;;  %p1854_p0 = scmp.ge.s32.totalorder %s2410_s23, 1  ;;  %s2410_s23 = sphi %s2448_s23, %s23_s23   ;;  %s2406_s22 = sphi %s2446_s22, %s2755_s22   ;;  %s2402_s21 = sphi %s2444_s21, %s2754_s21  }
   0x9   : > { %p40_p1 = scmp.ge.s32.totalorder %s38_s0, 9  ;;  %p226_p2 = scmp.lt.s32.totalorder %s2410_s23, 10 }
   0xb   : > { %s2757_s0 = smov (%p40_p1, %s38_s0), 0  ;;  %p227_p3 = pnand %p1854_p0, %p226_p2 }
   0xc   : > { %s284_s1 = sld [smem:[#allocation4]] (!%p227_p3)  ;;  %s1860_s24 = sshll.u32 (!%p227_p3), %s2402_s21, 6 }
   0xd   : > { %230 = sbr.rel (%p227_p3) target bundleno = 709 (0x2c5), region = 28  ;;  %p338_p4 = scmp.lt.s32.totalorder (!%p227_p3), %s1860_s24, 575 }
   0xe   : > { %s309_s25 = sld [smem:[#allocation3 + %s2402_s21]] (!%p227_p3) }
  0x12   : > { %s2759_s24 = smov (!%p338_p4, %s1860_s24), 575  ;;  %p285_p5 = scmp.lt.s32.totalorder %s2402_s21, %s284_s1 }
  0x13   : > { %s2252_s26 = sshll.u32 %s2759_s24, 3  ;;  %p1863_p8 = scmp.ge.s32.totalorder %s2402_s21, %s284_s1 }
  0x14   : > { %s2470_s29 = scalar_lea.vmem %s2753_s4, %s2252_s26 }
  0x15   : > { %s286_s30 = scalar_select %p285_p5, 1, 0 }
  0x17   : > { %s287_s5 = smul.u32 %s2402_s21, %s286_s30 }
  0x18   : > { %s310_s6 = smul.u32 %s309_s25, %s286_s30 }
  0x19   : > { %s1855_s7 = sshll.u32 %s287_s5, 6 }
  0x1a   : > { %p291_p6 = scmp.lt.s32.totalorder %s1855_s7, 575  ;;  %p315_p7 = scmp.lt.s32.totalorder %s310_s6, 7 }
  0x1b   : > { %352 = sbr.rel (%p1863_p8) target bundleno = 709 (0x2c5), region = 32 }
  0x1c   : > { %s2761_s7 = smov (!%p291_p6, %s1855_s7), 575  ;;  %s2763_s6 = smov (!%p315_p7, %s310_s6), 7 }
  0x1d   : > { %s2250_s8 = sshll.u32 %s2761_s7, 3  ;;  %s2251_s12 = sshll.u32 %s2763_s6, 8 }
  0x1e   : > { %s2476_s11 = scalar_lea.vmem %s2751_s2, %s2250_s8  ;;  %s2481_s15 = scalar_lea.vmem %s2752_s3, %s2251_s12 }
  0x20   : > { %v2178_v0 = vld [vmem:[%s2481_s15 + $0x70] sm:$0xf]  ;;  %v2332_v1 = vld [vmem:[%s2481_s15 + $0x74] sm:$0xf0]  ;;  %v2331_v5 = vld [vmem:[%s2481_s15 + $0x74] sm:$0xf] }
  0x21   : > { %v2242_v2 = vld [vmem:[%s2481_s15 + $0xf0] sm:$0xf]  ;;  %v2179_v3 = vor.u32 %v2332_v1, %v2178_v0  ;;  %v2348_v4 = vld [vmem:[%s2481_s15 + $0xf4] sm:$0xf0]  ;;  %v2180_v6 = vld [vmem:[%s2481_s15 + $0x78] sm:$0xf0] }
  0x22   : > { %v2243_v7 = vor.u32 %v2348_v4, %v2242_v2  ;;  %v2183_v8 = vor.u32 %v2331_v5, %v2180_v6  ;;  %v2347_v9 = vld [vmem:[%s2481_s15 + $0xf4] sm:$0xf]  ;;  %v2244_v10 = vld [vmem:[%s2481_s15 + $0xf8] sm:$0xf0]  ;;  %v2170_v11 = vld [vmem:[%s2481_s15 + $0x60] sm:$0xf] }
  0x23   : > { %929 = vmatpush.bf16.msra.mxu0 %v2179_v3  ;;  %v2247_v12 = vor.u32 %v2347_v9, %v2244_v10  ;;  %v2330_v13 = vld [vmem:[%s2481_s15 + $0x64] sm:$0xf0]  ;;  %v2234_v14 = vld [vmem:[%s2481_s15 + $0xe0] sm:$0xf]  ;;  %v2329_v18 = vld [vmem:[%s2481_s15 + $0x64] sm:$0xf] }
  0x24   : > { %v2346_v15 = vld [vmem:[%s2481_s15 + $0xe4] sm:$0xf0]  ;;  %1098 = vmatpush.bf16.msra.mxu1 %v2243_v7  ;;  %1267 = vmatpush.bf16.msra.mxu2 %v2183_v8  ;;  %v2171_v16 = vor.u32 %v2330_v13, %v2170_v11  ;;  %v2172_v19 = vld [vmem:[%s2481_s15 + $0x68] sm:$0xf0]  ;;  %v2345_v20 = vld [vmem:[%s2481_s15 + $0xe4] sm:$0xf] }
  0x25   : > { %v2235_v17 = vor.u32 %v2346_v15, %v2234_v14  ;;  %1436 = vmatpush.bf16.msra.mxu3 %v2247_v12  ;;  %v2175_v21 = vor.u32 %v2329_v18, %v2172_v19  ;;  %v2236_v22 = vld [vmem:[%s2481_s15 + $0xe8] sm:$0xf0]  ;;  %v2162_v23 = vld [vmem:[%s2481_s15 + $0x50] sm:$0xf]  ;;  %v2328_v24 = vld [vmem:[%s2481_s15 + $0x54] sm:$0xf0] }
  0x26   : > { %v2239_v25 = vor.u32 %v2345_v20, %v2236_v22  ;;  %v2226_v26 = vld [vmem:[%s2481_s15 + $0xd0] sm:$0xf]  ;;  %v2344_v27 = vld [vmem:[%s2481_s15 + $0xd4] sm:$0xf0]  ;;  %v2327_v28 = vld [vmem:[%s2481_s15 + $0x54] sm:$0xf]  ;;  %v2163_v29 = vor.u32 %v2328_v24, %v2162_v23 }
  0x27   : > { %930 = vmatpush.bf16.msra.mxu0 %v2171_v16  ;;  %v2164_v30 = vld [vmem:[%s2481_s15 + $0x58] sm:$0xf0]  ;;  %v2343_v31 = vld [vmem:[%s2481_s15 + $0xd4] sm:$0xf]  ;;  %v2227_v33 = vor.u32 %v2344_v27, %v2226_v26  ;;  %v2154_v35 = vld [vmem:[%s2481_s15 + $0x40] sm:$0xf] }
  0x28   : > { %v2228_v32 = vld [vmem:[%s2481_s15 + $0xd8] sm:$0xf0]  ;;  %1099 = vmatpush.bf16.msra.mxu1 %v2235_v17  ;;  %1268 = vmatpush.bf16.msra.mxu2 %v2175_v21  ;;  %v2167_v34 = vor.u32 %v2327_v28, %v2164_v30  ;;  %v2326_v36 = vld [vmem:[%s2481_s15 + $0x44] sm:$0xf0]  ;;  %v2218_v37 = vld [vmem:[%s2481_s15 + $0xc0] sm:$0xf] }
  0x29   : > { %1437 = vmatpush.bf16.msra.mxu3 %v2239_v25  ;;  %v2231_v38 = vor.u32 %v2343_v31, %v2228_v32  ;;  %v2342_v39 = vld [vmem:[%s2481_s15 + $0xc4] sm:$0xf0]  ;;  %v2325_v40 = vld [vmem:[%s2481_s15 + $0x44] sm:$0xf]  ;;  %v2156_v41 = vld [vmem:[%s2481_s15 + $0x48] sm:$0xf0]  ;;  %v2155_v44 = vor.u32 %v2326_v36, %v2154_v35 }
  0x2a   : > { %v2341_v42 = vld [vmem:[%s2481_s15 + $0xc4] sm:$0xf]  ;;  %v2220_v43 = vld [vmem:[%s2481_s15 + $0xc8] sm:$0xf0]  ;;  %v2219_v45 = vor.u32 %v2342_v39, %v2218_v37  ;;  %v2159_v46 = vor.u32 %v2325_v40, %v2156_v41  ;;  %v2146_v47 = vld [vmem:[%s2481_s15 + $0x30] sm:$0xf] }
  0x2b   : > { %931 = vmatpush.bf16.msra.mxu0 %v2163_v29  ;;  %v2324_v48 = vld [vmem:[%s2481_s15 + $0x34] sm:$0xf0]  ;;  %v2210_v49 = vld [vmem:[%s2481_s15 + $0xb0] sm:$0xf]  ;;  %v2223_v50 = vor.u32 %v2341_v42, %v2220_v43  ;;  %v2323_v52 = vld [vmem:[%s2481_s15 + $0x34] sm:$0xf] }
  0x2c   : > { %1100 = vmatpush.bf16.msra.mxu1 %v2227_v33  ;;  %1269 = vmatpush.bf16.msra.mxu2 %v2167_v34  ;;  %v2340_v51 = vld [vmem:[%s2481_s15 + $0xb4] sm:$0xf0]  ;;  %v2148_v53 = vld [vmem:[%s2481_s15 + $0x38] sm:$0xf0]  ;;  %v2339_v54 = vld [vmem:[%s2481_s15 + $0xb4] sm:$0xf]  ;;  %v2147_v56 = vor.u32 %v2324_v48, %v2146_v47 }
  0x2d   : > { %1438 = vmatpush.bf16.msra.mxu3 %v2231_v38  ;;  %v2212_v55 = vld [vmem:[%s2481_s15 + $0xb8] sm:$0xf0]  ;;  %v2211_v57 = vor.u32 %v2340_v51, %v2210_v49  ;;  %v2151_v58 = vor.u32 %v2323_v52, %v2148_v53  ;;  %v2138_v59 = vld [vmem:[%s2481_s15 + $0x20] sm:$0xf]  ;;  %v2322_v60 = vld [vmem:[%s2481_s15 + $0x24] sm:$0xf0] }
  0x2e   : > { %v2202_v61 = vld [vmem:[%s2481_s15 + $0xa0] sm:$0xf]  ;;  %v2215_v62 = vor.u32 %v2339_v54, %v2212_v55  ;;  %v2338_v63 = vld [vmem:[%s2481_s15 + $0xa4] sm:$0xf0]  ;;  %v2321_v0 = vld [vmem:[%s2481_s15 + $0x24] sm:$0xf]  ;;  %v2139_v4 = vor.u32 %v2322_v60, %v2138_v59 }
  0x2f   : > { %932 = vmatpush.bf16.msra.mxu0 %v2155_v44  ;;  %v2140_v1 = vld [vmem:[%s2481_s15 + $0x28] sm:$0xf0]  ;;  %v2337_v2 = vld [vmem:[%s2481_s15 + $0xa4] sm:$0xf]  ;;  %v2203_v5 = vor.u32 %v2338_v63, %v2202_v61  ;;  %v2130_v7 = vld [vmem:[%s2481_s15 + $0x10] sm:$0xf] }
  0x30   : > { %1101 = vmatpush.bf16.msra.mxu1 %v2219_v45  ;;  %1270 = vmatpush.bf16.msra.mxu2 %v2159_v46  ;;  %v2204_v3 = vld [vmem:[%s2481_s15 + $0xa8] sm:$0xf0]  ;;  %v2143_v6 = vor.u32 %v2321_v0, %v2140_v1  ;;  %v2320_v8 = vld [vmem:[%s2481_s15 + $0x14] sm:$0xf0]  ;;  %v2194_v9 = vld [vmem:[%s2481_s15 + $0x90] sm:$0xf] }
  0x31   : > { %1439 = vmatpush.bf16.msra.mxu3 %v2223_v50  ;;  %v2207_v10 = vor.u32 %v2337_v2, %v2204_v3  ;;  %v2336_v11 = vld [vmem:[%s2481_s15 + $0x94] sm:$0xf0]  ;;  %v2319_v12 = vld [vmem:[%s2481_s15 + $0x14] sm:$0xf]  ;;  %v2132_v13 = vld [vmem:[%s2481_s15 + $0x18] sm:$0xf0]  ;;  %v2131_v16 = vor.u32 %v2320_v8, %v2130_v7 }
  0x32   : > { %v2335_v14 = vld [vmem:[%s2481_s15 + $0x94] sm:$0xf]  ;;  %v2196_v15 = vld [vmem:[%s2481_s15 + $0x98] sm:$0xf0]  ;;  %v2195_v17 = vor.u32 %v2336_v11, %v2194_v9  ;;  %v2135_v18 = vor.u32 %v2319_v12, %v2132_v13  ;;  %v2122_v19 = vld [vmem:[%s2481_s15] sm:$0xf] }
  0x33   : > { %933 = vmatpush.bf16.msra.mxu0 %v2147_v56  ;;  %v2318_v20 = vld [vmem:[%s2481_s15 + $0x4] sm:$0xf0]  ;;  %v2186_v21 = vld [vmem:[%s2481_s15 + $0x80] sm:$0xf]  ;;  %v2199_v22 = vor.u32 %v2335_v14, %v2196_v15  ;;  %v2317_v24 = vld [vmem:[%s2481_s15 + $0x4] sm:$0xf] }
  0x34   : > { %1102 = vmatpush.bf16.msra.mxu1 %v2211_v57  ;;  %1271 = vmatpush.bf16.msra.mxu2 %v2151_v58  ;;  %v2334_v23 = vld [vmem:[%s2481_s15 + $0x84] sm:$0xf0]  ;;  %v2124_v25 = vld [vmem:[%s2481_s15 + $0x8] sm:$0xf0]  ;;  %v2333_v26 = vld [vmem:[%s2481_s15 + $0x84] sm:$0xf]  ;;  %v2123_v28 = vor.u32 %v2318_v20, %v2122_v19 }
  0x35   : > { %1440 = vmatpush.bf16.msra.mxu3 %v2215_v62  ;;  %v2188_v27 = vld [vmem:[%s2481_s15 + $0x88] sm:$0xf0]  ;;  %v1866_v29 = vld [vmem:[%s2476_s11] sm:$0xf]  ;;  %v2254_v30 = vld [vmem:[%s2476_s11 + $0x4] sm:$0xf0]  ;;  %v2187_v31 = vor.u32 %v2334_v23, %v2186_v21  ;;  %v2127_v32 = vor.u32 %v2317_v24, %v2124_v25 }
  0x36   : > { %v2253_v33 = vld [vmem:[%s2476_s11 + $0x4] sm:$0xf]  ;;  %v1868_v34 = vld [vmem:[%s2476_s11 + $0x8] sm:$0xf0]  ;;  %v2191_v35 = vor.u32 %v2333_v26, %v2188_v27  ;;  %v1867_v36 = vor.u32 %v2254_v30, %v1866_v29  ;;  %v1874_v38 = vld [vmem:[%s2476_s11 + $0x10] sm:$0xf] }
  0x37   : > { %934 = vmatpush.bf16.msra.mxu0 %v2139_v4  ;;  %v1871_v37 = vor.u32 %v2253_v33, %v1868_v34  ;;  %v2256_v39 = vld [vmem:[%s2476_s11 + $0x14] sm:$0xf0]  ;;  %v2255_v40 = vld [vmem:[%s2476_s11 + $0x14] sm:$0xf]  ;;  %v1876_v41 = vld [vmem:[%s2476_s11 + $0x18] sm:$0xf0] }
  0x38   : > { %1103 = vmatpush.bf16.msra.mxu1 %v2203_v5  ;;  %1272 = vmatpush.bf16.msra.mxu2 %v2143_v6  ;;  %v1875_v42 = vor.u32 %v2256_v39, %v1874_v38  ;;  %v1879_v43 = vor.u32 %v2255_v40, %v1876_v41  ;;  %v1882_v44 = vld [vmem:[%s2476_s11 + $0x20] sm:$0xf]  ;;  %v2258_v45 = vld [vmem:[%s2476_s11 + $0x24] sm:$0xf0]  ;;  %v2257_v46 = vld [vmem:[%s2476_s11 + $0x24] sm:$0xf] }
  0x39   : > { %1441 = vmatpush.bf16.msra.mxu3 %v2207_v10  ;;  %v1884_v47 = vld [vmem:[%s2476_s11 + $0x28] sm:$0xf0]  ;;  %v1883_v48 = vor.u32 %v2258_v45, %v1882_v44  ;;  %v1890_v50 = vld [vmem:[%s2476_s11 + $0x30] sm:$0xf]  ;;  %v2260_v51 = vld [vmem:[%s2476_s11 + $0x34] sm:$0xf0] }
  0x3a   : > { %v1887_v49 = vor.u32 %v2257_v46, %v1884_v47  ;;  %v2259_v52 = vld [vmem:[%s2476_s11 + $0x34] sm:$0xf]  ;;  %v1892_v53 = vld [vmem:[%s2476_s11 + $0x38] sm:$0xf0]  ;;  %v1891_v54 = vor.u32 %v2260_v51, %v1890_v50  ;;  %v1898_v56 = vld [vmem:[%s2476_s11 + $0x40] sm:$0xf] }
  0x3b   : > { %935 = vmatpush.bf16.msra.mxu0 %v2131_v16  ;;  %v1895_v55 = vor.u32 %v2259_v52, %v1892_v53  ;;  %v2262_v57 = vld [vmem:[%s2476_s11 + $0x44] sm:$0xf0]  ;;  %v2261_v58 = vld [vmem:[%s2476_s11 + $0x44] sm:$0xf]  ;;  %v1900_v59 = vld [vmem:[%s2476_s11 + $0x48] sm:$0xf0] }
  0x3c   : > { %1104 = vmatpush.bf16.msra.mxu1 %v2195_v17  ;;  %1273 = vmatpush.bf16.msra.mxu2 %v2135_v18  ;;  %v1899_v60 = vor.u32 %v2262_v57, %v1898_v56  ;;  %v1903_v61 = vor.u32 %v2261_v58, %v1900_v59  ;;  %v1906_v62 = vld [vmem:[%s2476_s11 + $0x50] sm:$0xf]  ;;  %v2264_v63 = vld [vmem:[%s2476_s11 + $0x54] sm:$0xf0]  ;;  %v2263_v0 = vld [vmem:[%s2476_s11 + $0x54] sm:$0xf] }
  0x3d   : > { %1442 = vmatpush.bf16.msra.mxu3 %v2199_v22  ;;  %v1908_v1 = vld [vmem:[%s2476_s11 + $0x58] sm:$0xf0]  ;;  %v1907_v2 = vor.u32 %v2264_v63, %v1906_v62  ;;  %v1914_v4 = vld [vmem:[%s2476_s11 + $0x60] sm:$0xf]  ;;  %v2266_v5 = vld [vmem:[%s2476_s11 + $0x64] sm:$0xf0] }
  0x3e   : > { %v1911_v3 = vor.u32 %v2263_v0, %v1908_v1  ;;  %v2265_v6 = vld [vmem:[%s2476_s11 + $0x64] sm:$0xf]  ;;  %v1916_v7 = vld [vmem:[%s2476_s11 + $0x68] sm:$0xf0]  ;;  %v1915_v8 = vor.u32 %v2266_v5, %v1914_v4  ;;  %v1922_v10 = vld [vmem:[%s2476_s11 + $0x70] sm:$0xf] }
  0x3f   : > { %936 = vmatpush.bf16.msra.mxu0 %v2123_v28  ;;  %v1919_v9 = vor.u32 %v2265_v6, %v1916_v7  ;;  %v2268_v11 = vld [vmem:[%s2476_s11 + $0x74] sm:$0xf0]  ;;  %v2267_v12 = vld [vmem:[%s2476_s11 + $0x74] sm:$0xf]  ;;  %v1924_v13 = vld [vmem:[%s2476_s11 + $0x78] sm:$0xf0] }
  0x40   : > { %1105 = vmatpush.bf16.msra.mxu1 %v2187_v31  ;;  %1274 = vmatpush.bf16.msra.mxu2 %v2127_v32  ;;  %v1923_v14 = vor.u32 %v2268_v11, %v1922_v10  ;;  %v1927_v15 = vor.u32 %v2267_v12, %v1924_v13  ;;  %v1930_v16 = vld [vmem:[%s2476_s11 + $0x80] sm:$0xf]  ;;  %v2270_v17 = vld [vmem:[%s2476_s11 + $0x84] sm:$0xf0]  ;;  %v2269_v18 = vld [vmem:[%s2476_s11 + $0x84] sm:$0xf] }
  0x41   : > { %1443 = vmatpush.bf16.msra.mxu3 %v2191_v35  ;;  %v1932_v19 = vld [vmem:[%s2476_s11 + $0x88] sm:$0xf0]  ;;  %v1931_v20 = vor.u32 %v2270_v17, %v1930_v16  ;;  %v1938_v31 = vld [vmem:[%s2476_s11 + $0x90] sm:$0xf]  ;;  %v2272_v32 = vld [vmem:[%s2476_s11 + $0x94] sm:$0xf0] }
  0x42   : > { %937 = vmatmul.bf16.vlgmr.msra.gmra.mxu0 %v1867_v36  ;;  %v1935_v22 = vor.u32 %v2269_v18, %v1932_v19  ;;  %v2271_v33 = vld [vmem:[%s2476_s11 + $0x94] sm:$0xf]  ;;  %v1940_v34 = vld [vmem:[%s2476_s11 + $0x98] sm:$0xf0]  ;;  %v1946_v51 = vld [vmem:[%s2476_s11 + $0xa0] sm:$0xf] }
  0x43   : > { %1106 = vmatmul.bf16.vlgmr.msra.gmra.mxu1 %v1871_v37  ;;  %1275 = vmatmul.bf16.vlgmr.msra.gmra.mxu2 %v1867_v36  ;;  %v1939_v36 = vor.u32 %v2272_v32, %v1938_v31  ;;  %v1943_v39 = vor.u32 %v2271_v33, %v1940_v34  ;;  %v2274_v52 = vld [vmem:[%s2476_s11 + $0xa4] sm:$0xf0]  ;;  %v2273_v53 = vld [vmem:[%s2476_s11 + $0xa4] sm:$0xf]  ;;  %v1954_v7 = vld [vmem:[%s2476_s11 + $0xb0] sm:$0xf] }
  0x44   : > { %1444 = vmatmul.bf16.vlgmr.msra.gmra.mxu3 %v1871_v37  ;;  %v1947_v56 = vor.u32 %v2274_v52, %v1946_v51  ;;  %v1956_v10 = vld [vmem:[%s2476_s11 + $0xb8] sm:$0xf0] }
  0x52   : > { %942 = vmatmul.bf16.gmra.mxu0 %v1875_v42 }
  0x53   : > { %1111 = vmatmul.bf16.gmra.mxu1 %v1879_v43  ;;  %1280 = vmatmul.bf16.gmra.mxu2 %v1875_v42 }
  0x54   : > { %1449 = vmatmul.bf16.gmra.mxu3 %v1879_v43 }
  0x62   : > { %947 = vmatmul.bf16.gmra.mxu0 %v1883_v48 }
  0x63   : > { %1116 = vmatmul.bf16.gmra.mxu1 %v1887_v49  ;;  %1285 = vmatmul.bf16.gmra.mxu2 %v1883_v48 }
  0x64   : > { %1454 = vmatmul.bf16.gmra.mxu3 %v1887_v49 }
  0x72   : > { %952 = vmatmul.bf16.gmra.mxu0 %v1891_v54 }
  0x73   : > { %1121 = vmatmul.bf16.gmra.mxu1 %v1895_v55  ;;  %1290 = vmatmul.bf16.gmra.mxu2 %v1891_v54  ;;  %v1948_v54 = vld [vmem:[%s2476_s11 + $0xa8] sm:$0xf0] }
  0x74   : > { %1459 = vmatmul.bf16.gmra.mxu3 %v1895_v55  ;;  %v1951_v59 = vor.u32 %v2273_v53, %v1948_v54 }
  0x82   : > { %957 = vmatmul.bf16.gmra.mxu0 %v1899_v60 }
  0x83   : > { %1126 = vmatmul.bf16.gmra.mxu1 %v1903_v61  ;;  %1295 = vmatmul.bf16.gmra.mxu2 %v1899_v60 }
  0x84   : > { %1464 = vmatmul.bf16.gmra.mxu3 %v1903_v61 }
  0x92   : > { %962 = vmatmul.bf16.gmra.mxu0 %v1907_v2 }
  0x93   : > { %1131 = vmatmul.bf16.gmra.mxu1 %v1911_v3  ;;  %1300 = vmatmul.bf16.gmra.mxu2 %v1907_v2 }
  0x94   : > { %1469 = vmatmul.bf16.gmra.mxu3 %v1911_v3 }
  0xa2   : > { %967 = vmatmul.bf16.gmra.mxu0 %v1915_v8 }
  0xa3   : > { %1136 = vmatmul.bf16.gmra.mxu1 %v1919_v9  ;;  %1305 = vmatmul.bf16.gmra.mxu2 %v1915_v8  ;;  %v2276_v8 = vld [vmem:[%s2476_s11 + $0xb4] sm:$0xf0] }
  0xa4   : > { %1474 = vmatmul.bf16.gmra.mxu3 %v1919_v9  ;;  %v2275_v9 = vld [vmem:[%s2476_s11 + $0xb4] sm:$0xf]  ;;  %v1955_v12 = vor.u32 %v2276_v8, %v1954_v7 }
  0xb2   : > { %972 = vmatmul.bf16.gmra.mxu0 %v1923_v14 }
  0xb3   : > { %1141 = vmatmul.bf16.gmra.mxu1 %v1927_v15  ;;  %1310 = vmatmul.bf16.gmra.mxu2 %v1923_v14 }
  0xb4   : > { %1479 = vmatmul.bf16.gmra.mxu3 %v1927_v15  ;;  %v1959_v15 = vor.u32 %v2275_v9, %v1956_v10 }
  0xbf   : > { %v938_v21 = vpop.f32.mrf.mxu0 }
  0xc0   : > { %v1107_v23 = vpop.f32.mrf.mxu1 }
  0xc1   : > { %v1108_v24 = vadd.f32 %v1107_v23, %v938_v21 }
  0xc2   : > { %977 = vmatmul.bf16.gmra.mxu0 %v1931_v20 }
  0xc3   : > { %1146 = vmatmul.bf16.gmra.mxu1 %v1935_v22  ;;  %1315 = vmatmul.bf16.gmra.mxu2 %v1931_v20 }
  0xc4   : > { %1484 = vmatmul.bf16.gmra.mxu3 %v1935_v22 }
  0xc6   : > { %v1276_v25 = vpop.f32.mrf.mxu2 }
  0xc7   : > { %v1445_v26 = vpop.f32.mrf.mxu3  ;;  %v940_v27 = vpop.f32.mrf.mxu0 }
  0xc8   : > { %v1446_v28 = vadd.f32 %v1445_v26, %v1276_v25  ;;  %v1109_v29 = vpop.f32.mrf.mxu1 }
  0xc9   : > { %v1110_v40 = vadd.f32 %v1109_v29, %v940_v27  ;;  %v1962_v27 = vld [vmem:[%s2476_s11 + $0xc0] sm:$0xf]  ;;  %v2277_v29 = vld [vmem:[%s2476_s11 + $0xc4] sm:$0xf] }
  0xca   : > { %v1605_v30 = vpack.c.bf16 %v1446_v28, %v1108_v24  ;;  %v2278_v28 = vld [vmem:[%s2476_s11 + $0xc4] sm:$0xf0] }
  0xcb   : > { %v1963_v32 = vor.u32 %v2278_v28, %v1962_v27 }
  0xcc   : > { %1669 = vst [vmem:[%s2470_s29] sm:$0xff] %v1605_v30  ;;  %v1964_v30 = vld [vmem:[%s2476_s11 + $0xc8] sm:$0xf0] }
  0xce   : > { %v1278_v35 = vpop.f32.mrf.mxu2 }
  0xcf   : > { %v1447_v37 = vpop.f32.mrf.mxu3  ;;  %v943_v38 = vpop.f32.mrf.mxu0 }
  0xd0   : > { %v1448_v41 = vadd.f32 %v1447_v37, %v1278_v35  ;;  %v1112_v42 = vpop.f32.mrf.mxu1  ;;  %v1967_v35 = vor.u32 %v2277_v29, %v1964_v30 }
  0xd1   : > { %v1113_v44 = vadd.f32 %v1112_v42, %v943_v38 }
  0xd2   : > { %v1606_v43 = vpack.c.bf16 %v1448_v41, %v1110_v40  ;;  %982 = vmatmul.bf16.gmra.mxu0 %v1939_v36 }
  0xd3   : > { %1151 = vmatmul.bf16.gmra.mxu1 %v1943_v39  ;;  %1320 = vmatmul.bf16.gmra.mxu2 %v1939_v36 }
  0xd4   : > { %1670 = vst [vmem:[%s2470_s29 + $0x8] sm:$0xff] %v1606_v43  ;;  %1489 = vmatmul.bf16.gmra.mxu3 %v1943_v39 }
  0xd6   : > { %v1281_v45 = vpop.f32.mrf.mxu2 }
  0xd7   : > { %v1450_v46 = vpop.f32.mrf.mxu3  ;;  %v945_v47 = vpop.f32.mrf.mxu0 }
  0xd8   : > { %v1451_v48 = vadd.f32 %v1450_v46, %v1281_v45  ;;  %v1114_v49 = vpop.f32.mrf.mxu1 }
  0xd9   : > { %v1115_v60 = vadd.f32 %v1114_v49, %v945_v47  ;;  %v1970_v47 = vld [vmem:[%s2476_s11 + $0xd0] sm:$0xf]  ;;  %v2279_v49 = vld [vmem:[%s2476_s11 + $0xd4] sm:$0xf] }
  0xda   : > { %v1607_v50 = vpack.c.bf16 %v1451_v48, %v1113_v44  ;;  %v2280_v48 = vld [vmem:[%s2476_s11 + $0xd4] sm:$0xf0] }
  0xdb   : > { %v1971_v52 = vor.u32 %v2280_v48, %v1970_v47 }
  0xdc   : > { %1671 = vst [vmem:[%s2470_s29 + $0x10] sm:$0xff] %v1607_v50  ;;  %v1972_v50 = vld [vmem:[%s2476_s11 + $0xd8] sm:$0xf0] }
  0xde   : > { %v1283_v55 = vpop.f32.mrf.mxu2 }
  0xdf   : > { %v1452_v57 = vpop.f32.mrf.mxu3  ;;  %v948_v58 = vpop.f32.mrf.mxu0 }
  0xe0   : > { %v1453_v61 = vadd.f32 %v1452_v57, %v1283_v55  ;;  %v1117_v62 = vpop.f32.mrf.mxu1  ;;  %v1975_v55 = vor.u32 %v2279_v49, %v1972_v50 }
  0xe1   : > { %v1118_v0 = vadd.f32 %v1117_v62, %v948_v58 }
  0xe2   : > { %v1608_v63 = vpack.c.bf16 %v1453_v61, %v1115_v60  ;;  %987 = vmatmul.bf16.gmra.mxu0 %v1947_v56 }
  0xe3   : > { %1156 = vmatmul.bf16.gmra.mxu1 %v1951_v59  ;;  %1325 = vmatmul.bf16.gmra.mxu2 %v1947_v56 }
  0xe4   : > { %1672 = vst [vmem:[%s2470_s29 + $0x18] sm:$0xff] %v1608_v63  ;;  %1494 = vmatmul.bf16.gmra.mxu3 %v1951_v59 }
  0xe6   : > { %v1286_v1 = vpop.f32.mrf.mxu2 }
  0xe7   : > { %v1455_v2 = vpop.f32.mrf.mxu3  ;;  %v950_v3 = vpop.f32.mrf.mxu0 }
  0xe8   : > { %v1456_v4 = vadd.f32 %v1455_v2, %v1286_v1  ;;  %v1119_v5 = vpop.f32.mrf.mxu1 }
  0xe9   : > { %v1120_v16 = vadd.f32 %v1119_v5, %v950_v3  ;;  %v1978_v3 = vld [vmem:[%s2476_s11 + $0xe0] sm:$0xf]  ;;  %v2281_v5 = vld [vmem:[%s2476_s11 + $0xe4] sm:$0xf] }
  0xea   : > { %v1609_v6 = vpack.c.bf16 %v1456_v4, %v1118_v0  ;;  %v2282_v4 = vld [vmem:[%s2476_s11 + $0xe4] sm:$0xf0] }
  0xeb   : > { %v1979_v8 = vor.u32 %v2282_v4, %v1978_v3 }
  0xec   : > { %1673 = vst [vmem:[%s2470_s29 + $0x20] sm:$0xff] %v1609_v6  ;;  %v1980_v6 = vld [vmem:[%s2476_s11 + $0xe8] sm:$0xf0] }
  0xee   : > { %v1288_v11 = vpop.f32.mrf.mxu2 }
  0xef   : > { %v1457_v13 = vpop.f32.mrf.mxu3  ;;  %v953_v14 = vpop.f32.mrf.mxu0 }
  0xf0   : > { %v1458_v17 = vadd.f32 %v1457_v13, %v1288_v11  ;;  %v1122_v18 = vpop.f32.mrf.mxu1  ;;  %v1983_v11 = vor.u32 %v2281_v5, %v1980_v6 }
  0xf1   : > { %v1123_v20 = vadd.f32 %v1122_v18, %v953_v14 }
  0xf2   : > { %v1610_v19 = vpack.c.bf16 %v1458_v17, %v1120_v16  ;;  %992 = vmatmul.bf16.gmra.mxu0 %v1955_v12 }
  0xf3   : > { %1161 = vmatmul.bf16.gmra.mxu1 %v1959_v15  ;;  %1330 = vmatmul.bf16.gmra.mxu2 %v1955_v12 }
  0xf4   : > { %1674 = vst [vmem:[%s2470_s29 + $0x28] sm:$0xff] %v1610_v19  ;;  %1499 = vmatmul.bf16.gmra.mxu3 %v1959_v15 }
  0xf6   : > { %v1291_v21 = vpop.f32.mrf.mxu2 }
  0xf7   : > { %v1460_v22 = vpop.f32.mrf.mxu3  ;;  %v955_v23 = vpop.f32.mrf.mxu0 }
  0xf8   : > { %v1461_v24 = vadd.f32 %v1460_v22, %v1291_v21  ;;  %v1124_v25 = vpop.f32.mrf.mxu1 }
  0xf9   : > { %v1125_v36 = vadd.f32 %v1124_v25, %v955_v23  ;;  %v1986_v23 = vld [vmem:[%s2476_s11 + $0xf0] sm:$0xf]  ;;  %v2283_v25 = vld [vmem:[%s2476_s11 + $0xf4] sm:$0xf] }
  0xfa   : > { %v1611_v26 = vpack.c.bf16 %v1461_v24, %v1123_v20  ;;  %v2284_v24 = vld [vmem:[%s2476_s11 + $0xf4] sm:$0xf0] }
  0xfb   : > { %v1987_v28 = vor.u32 %v2284_v24, %v1986_v23 }
  0xfc   : > { %1675 = vst [vmem:[%s2470_s29 + $0x30] sm:$0xff] %v1611_v26  ;;  %v1988_v26 = vld [vmem:[%s2476_s11 + $0xf8] sm:$0xf0] }
  0xfe   : > { %v1293_v31 = vpop.f32.mrf.mxu2 }
  0xff   : > { %v1462_v33 = vpop.f32.mrf.mxu3  ;;  %v958_v34 = vpop.f32.mrf.mxu0 }
 0x100   : > { %v1463_v37 = vadd.f32 %v1462_v33, %v1293_v31  ;;  %v1127_v38 = vpop.f32.mrf.mxu1  ;;  %v1991_v31 = vor.u32 %v2283_v25, %v1988_v26 }
 0x101   : > { %v1128_v40 = vadd.f32 %v1127_v38, %v958_v34 }
 0x102   : > { %v1612_v39 = vpack.c.bf16 %v1463_v37, %v1125_v36  ;;  %997 = vmatmul.bf16.gmra.mxu0 %v1963_v32 }
 0x103   : > { %1166 = vmatmul.bf16.gmra.mxu1 %v1967_v35  ;;  %1335 = vmatmul.bf16.gmra.mxu2 %v1963_v32 }
 0x104   : > { %1676 = vst [vmem:[%s2470_s29 + $0x38] sm:$0xff] %v1612_v39  ;;  %1504 = vmatmul.bf16.gmra.mxu3 %v1967_v35 }
 0x106   : > { %v1296_v41 = vpop.f32.mrf.mxu2 }
 0x107   : > { %v1465_v42 = vpop.f32.mrf.mxu3  ;;  %v960_v43 = vpop.f32.mrf.mxu0 }
 0x108   : > { %v1466_v44 = vadd.f32 %v1465_v42, %v1296_v41  ;;  %v1129_v45 = vpop.f32.mrf.mxu1 }
 0x109   : > { %v1130_v56 = vadd.f32 %v1129_v45, %v960_v43  ;;  %v1994_v43 = vld [vmem:[%s2476_s11 + $0x100] sm:$0xf]  ;;  %v2285_v45 = vld [vmem:[%s2476_s11 + $0x104] sm:$0xf] }
 0x10a   : > { %v1613_v46 = vpack.c.bf16 %v1466_v44, %v1128_v40  ;;  %v2286_v44 = vld [vmem:[%s2476_s11 + $0x104] sm:$0xf0] }
 0x10b   : > { %v1995_v48 = vor.u32 %v2286_v44, %v1994_v43 }
 0x10c   : > { %1677 = vst [vmem:[%s2470_s29 + $0x40] sm:$0xff] %v1613_v46  ;;  %v1996_v46 = vld [vmem:[%s2476_s11 + $0x108] sm:$0xf0] }
 0x10e   : > { %v1298_v51 = vpop.f32.mrf.mxu2 }
 0x10f   : > { %v1467_v53 = vpop.f32.mrf.mxu3  ;;  %v963_v54 = vpop.f32.mrf.mxu0 }
 0x110   : > { %v1468_v57 = vadd.f32 %v1467_v53, %v1298_v51  ;;  %v1132_v58 = vpop.f32.mrf.mxu1  ;;  %v1999_v51 = vor.u32 %v2285_v45, %v1996_v46 }
 0x111   : > { %v1133_v60 = vadd.f32 %v1132_v58, %v963_v54 }
 0x112   : > { %v1614_v59 = vpack.c.bf16 %v1468_v57, %v1130_v56  ;;  %1002 = vmatmul.bf16.gmra.mxu0 %v1971_v52 }
 0x113   : > { %1171 = vmatmul.bf16.gmra.mxu1 %v1975_v55  ;;  %1340 = vmatmul.bf16.gmra.mxu2 %v1971_v52 }
 0x114   : > { %1678 = vst [vmem:[%s2470_s29 + $0x48] sm:$0xff] %v1614_v59  ;;  %1509 = vmatmul.bf16.gmra.mxu3 %v1975_v55 }
 0x116   : > { %v1301_v61 = vpop.f32.mrf.mxu2 }
 0x117   : > { %v1470_v62 = vpop.f32.mrf.mxu3  ;;  %v965_v63 = vpop.f32.mrf.mxu0 }
 0x118   : > { %v1471_v0 = vadd.f32 %v1470_v62, %v1301_v61  ;;  %v1134_v1 = vpop.f32.mrf.mxu1 }
 0x119   : > { %v1135_v12 = vadd.f32 %v1134_v1, %v965_v63  ;;  %v2002_v63 = vld [vmem:[%s2476_s11 + $0x110] sm:$0xf]  ;;  %v2287_v1 = vld [vmem:[%s2476_s11 + $0x114] sm:$0xf] }
 0x11a   : > { %v1615_v2 = vpack.c.bf16 %v1471_v0, %v1133_v60  ;;  %v2288_v0 = vld [vmem:[%s2476_s11 + $0x114] sm:$0xf0] }
 0x11b   : > { %v2003_v4 = vor.u32 %v2288_v0, %v2002_v63 }
 0x11c   : > { %1679 = vst [vmem:[%s2470_s29 + $0x50] sm:$0xff] %v1615_v2  ;;  %v2004_v2 = vld [vmem:[%s2476_s11 + $0x118] sm:$0xf0] }
 0x11e   : > { %v1303_v7 = vpop.f32.mrf.mxu2 }
 0x11f   : > { %v1472_v9 = vpop.f32.mrf.mxu3  ;;  %v968_v10 = vpop.f32.mrf.mxu0 }
 0x120   : > { %v1473_v13 = vadd.f32 %v1472_v9, %v1303_v7  ;;  %v1137_v14 = vpop.f32.mrf.mxu1  ;;  %v2007_v7 = vor.u32 %v2287_v1, %v2004_v2 }
 0x121   : > { %v1138_v16 = vadd.f32 %v1137_v14, %v968_v10 }
 0x122   : > { %v1616_v15 = vpack.c.bf16 %v1473_v13, %v1135_v12  ;;  %1007 = vmatmul.bf16.gmra.mxu0 %v1979_v8 }
 0x123   : > { %1176 = vmatmul.bf16.gmra.mxu1 %v1983_v11  ;;  %1345 = vmatmul.bf16.gmra.mxu2 %v1979_v8 }
 0x124   : > { %1680 = vst [vmem:[%s2470_s29 + $0x58] sm:$0xff] %v1616_v15  ;;  %1514 = vmatmul.bf16.gmra.mxu3 %v1983_v11 }
 0x126   : > { %v1306_v17 = vpop.f32.mrf.mxu2 }
 0x127   : > { %v1475_v18 = vpop.f32.mrf.mxu3  ;;  %v970_v19 = vpop.f32.mrf.mxu0 }
 0x128   : > { %v1476_v20 = vadd.f32 %v1475_v18, %v1306_v17  ;;  %v1139_v21 = vpop.f32.mrf.mxu1 }
 0x129   : > { %v1140_v32 = vadd.f32 %v1139_v21, %v970_v19  ;;  %v2010_v19 = vld [vmem:[%s2476_s11 + $0x120] sm:$0xf]  ;;  %v2289_v21 = vld [vmem:[%s2476_s11 + $0x124] sm:$0xf] }
 0x12a   : > { %v1617_v22 = vpack.c.bf16 %v1476_v20, %v1138_v16  ;;  %v2290_v20 = vld [vmem:[%s2476_s11 + $0x124] sm:$0xf0] }
 0x12b   : > { %v2011_v24 = vor.u32 %v2290_v20, %v2010_v19 }
 0x12c   : > { %1681 = vst [vmem:[%s2470_s29 + $0x60] sm:$0xff] %v1617_v22  ;;  %v2012_v22 = vld [vmem:[%s2476_s11 + $0x128] sm:$0xf0] }
 0x12e   : > { %v1308_v27 = vpop.f32.mrf.mxu2 }
 0x12f   : > { %v1477_v29 = vpop.f32.mrf.mxu3  ;;  %v973_v30 = vpop.f32.mrf.mxu0 }
 0x130   : > { %v1478_v33 = vadd.f32 %v1477_v29, %v1308_v27  ;;  %v1142_v34 = vpop.f32.mrf.mxu1  ;;  %v2015_v27 = vor.u32 %v2289_v21, %v2012_v22 }
 0x131   : > { %v1143_v36 = vadd.f32 %v1142_v34, %v973_v30 }
 0x132   : > { %v1618_v35 = vpack.c.bf16 %v1478_v33, %v1140_v32  ;;  %1012 = vmatmul.bf16.gmra.mxu0 %v1987_v28 }
 0x133   : > { %1181 = vmatmul.bf16.gmra.mxu1 %v1991_v31  ;;  %1350 = vmatmul.bf16.gmra.mxu2 %v1987_v28 }
 0x134   : > { %1682 = vst [vmem:[%s2470_s29 + $0x68] sm:$0xff] %v1618_v35  ;;  %1519 = vmatmul.bf16.gmra.mxu3 %v1991_v31 }
 0x136   : > { %v1311_v37 = vpop.f32.mrf.mxu2 }
 0x137   : > { %v1480_v38 = vpop.f32.mrf.mxu3  ;;  %v975_v39 = vpop.f32.mrf.mxu0 }
 0x138   : > { %v1481_v40 = vadd.f32 %v1480_v38, %v1311_v37  ;;  %v1144_v41 = vpop.f32.mrf.mxu1 }
 0x139   : > { %v1145_v52 = vadd.f32 %v1144_v41, %v975_v39  ;;  %v2018_v39 = vld [vmem:[%s2476_s11 + $0x130] sm:$0xf]  ;;  %v2291_v41 = vld [vmem:[%s2476_s11 + $0x134] sm:$0xf] }
 0x13a   : > { %v1619_v42 = vpack.c.bf16 %v1481_v40, %v1143_v36  ;;  %v2292_v40 = vld [vmem:[%s2476_s11 + $0x134] sm:$0xf0] }
 0x13b   : > { %v2019_v44 = vor.u32 %v2292_v40, %v2018_v39 }
 0x13c   : > { %1683 = vst [vmem:[%s2470_s29 + $0x70] sm:$0xff] %v1619_v42  ;;  %v2020_v42 = vld [vmem:[%s2476_s11 + $0x138] sm:$0xf0] }
 0x13e   : > { %v1313_v47 = vpop.f32.mrf.mxu2 }
 0x13f   : > { %v1482_v49 = vpop.f32.mrf.mxu3  ;;  %v978_v50 = vpop.f32.mrf.mxu0 }
 0x140   : > { %v1483_v53 = vadd.f32 %v1482_v49, %v1313_v47  ;;  %v1147_v54 = vpop.f32.mrf.mxu1  ;;  %v2023_v47 = vor.u32 %v2291_v41, %v2020_v42 }
 0x141   : > { %v1148_v56 = vadd.f32 %v1147_v54, %v978_v50 }
 0x142   : > { %v1620_v55 = vpack.c.bf16 %v1483_v53, %v1145_v52  ;;  %1017 = vmatmul.bf16.gmra.mxu0 %v1995_v48 }
 0x143   : > { %1186 = vmatmul.bf16.gmra.mxu1 %v1999_v51  ;;  %1355 = vmatmul.bf16.gmra.mxu2 %v1995_v48 }
 0x144   : > { %1684 = vst [vmem:[%s2470_s29 + $0x78] sm:$0xff] %v1620_v55  ;;  %1524 = vmatmul.bf16.gmra.mxu3 %v1999_v51 }
 0x146   : > { %v1316_v57 = vpop.f32.mrf.mxu2 }
 0x147   : > { %v1485_v58 = vpop.f32.mrf.mxu3  ;;  %v980_v59 = vpop.f32.mrf.mxu0 }
 0x148   : > { %v1486_v60 = vadd.f32 %v1485_v58, %v1316_v57  ;;  %v1149_v61 = vpop.f32.mrf.mxu1 }
 0x149   : > { %v1150_v8 = vadd.f32 %v1149_v61, %v980_v59  ;;  %v2026_v59 = vld [vmem:[%s2476_s11 + $0x140] sm:$0xf]  ;;  %v2293_v61 = vld [vmem:[%s2476_s11 + $0x144] sm:$0xf] }
 0x14a   : > { %v1621_v62 = vpack.c.bf16 %v1486_v60, %v1148_v56  ;;  %v2294_v60 = vld [vmem:[%s2476_s11 + $0x144] sm:$0xf0] }
 0x14b   : > { %v2027_v0 = vor.u32 %v2294_v60, %v2026_v59 }
 0x14c   : > { %1685 = vst [vmem:[%s2470_s29 + $0x80] sm:$0xff] %v1621_v62  ;;  %v2028_v62 = vld [vmem:[%s2476_s11 + $0x148] sm:$0xf0] }
 0x14e   : > { %v1318_v3 = vpop.f32.mrf.mxu2 }
 0x14f   : > { %v1487_v5 = vpop.f32.mrf.mxu3  ;;  %v983_v6 = vpop.f32.mrf.mxu0 }
 0x150   : > { %v1488_v9 = vadd.f32 %v1487_v5, %v1318_v3  ;;  %v1152_v10 = vpop.f32.mrf.mxu1  ;;  %v2031_v3 = vor.u32 %v2293_v61, %v2028_v62 }
 0x151   : > { %v1153_v12 = vadd.f32 %v1152_v10, %v983_v6 }
 0x152   : > { %v1622_v11 = vpack.c.bf16 %v1488_v9, %v1150_v8  ;;  %1022 = vmatmul.bf16.gmra.mxu0 %v2003_v4 }
 0x153   : > { %1191 = vmatmul.bf16.gmra.mxu1 %v2007_v7  ;;  %1360 = vmatmul.bf16.gmra.mxu2 %v2003_v4 }
 0x154   : > { %1686 = vst [vmem:[%s2470_s29 + $0x88] sm:$0xff] %v1622_v11  ;;  %1529 = vmatmul.bf16.gmra.mxu3 %v2007_v7 }
 0x156   : > { %v1321_v13 = vpop.f32.mrf.mxu2 }
 0x157   : > { %v1490_v14 = vpop.f32.mrf.mxu3  ;;  %v985_v15 = vpop.f32.mrf.mxu0 }
 0x158   : > { %v1491_v16 = vadd.f32 %v1490_v14, %v1321_v13  ;;  %v1154_v17 = vpop.f32.mrf.mxu1 }
 0x159   : > { %v1155_v28 = vadd.f32 %v1154_v17, %v985_v15  ;;  %v2034_v15 = vld [vmem:[%s2476_s11 + $0x150] sm:$0xf]  ;;  %v2295_v17 = vld [vmem:[%s2476_s11 + $0x154] sm:$0xf] }
 0x15a   : > { %v1623_v18 = vpack.c.bf16 %v1491_v16, %v1153_v12  ;;  %v2296_v16 = vld [vmem:[%s2476_s11 + $0x154] sm:$0xf0] }
 0x15b   : > { %v2035_v20 = vor.u32 %v2296_v16, %v2034_v15 }
 0x15c   : > { %1687 = vst [vmem:[%s2470_s29 + $0x90] sm:$0xff] %v1623_v18  ;;  %v2036_v18 = vld [vmem:[%s2476_s11 + $0x158] sm:$0xf0] }
 0x15e   : > { %v1323_v23 = vpop.f32.mrf.mxu2 }
 0x15f   : > { %v1492_v25 = vpop.f32.mrf.mxu3  ;;  %v988_v26 = vpop.f32.mrf.mxu0 }
 0x160   : > { %v1493_v29 = vadd.f32 %v1492_v25, %v1323_v23  ;;  %v1157_v30 = vpop.f32.mrf.mxu1  ;;  %v2039_v23 = vor.u32 %v2295_v17, %v2036_v18 }
 0x161   : > { %v1158_v32 = vadd.f32 %v1157_v30, %v988_v26 }
 0x162   : > { %v1624_v31 = vpack.c.bf16 %v1493_v29, %v1155_v28  ;;  %1027 = vmatmul.bf16.gmra.mxu0 %v2011_v24 }
 0x163   : > { %1196 = vmatmul.bf16.gmra.mxu1 %v2015_v27  ;;  %1365 = vmatmul.bf16.gmra.mxu2 %v2011_v24 }
 0x164   : > { %1688 = vst [vmem:[%s2470_s29 + $0x98] sm:$0xff] %v1624_v31  ;;  %1534 = vmatmul.bf16.gmra.mxu3 %v2015_v27 }
 0x166   : > { %v1326_v33 = vpop.f32.mrf.mxu2 }
 0x167   : > { %v1495_v34 = vpop.f32.mrf.mxu3  ;;  %v990_v35 = vpop.f32.mrf.mxu0 }
 0x168   : > { %v1496_v36 = vadd.f32 %v1495_v34, %v1326_v33  ;;  %v1159_v37 = vpop.f32.mrf.mxu1 }
 0x169   : > { %v1160_v48 = vadd.f32 %v1159_v37, %v990_v35  ;;  %v2042_v35 = vld [vmem:[%s2476_s11 + $0x160] sm:$0xf]  ;;  %v2297_v37 = vld [vmem:[%s2476_s11 + $0x164] sm:$0xf] }
 0x16a   : > { %v1625_v38 = vpack.c.bf16 %v1496_v36, %v1158_v32  ;;  %v2298_v36 = vld [vmem:[%s2476_s11 + $0x164] sm:$0xf0] }
 0x16b   : > { %v2043_v40 = vor.u32 %v2298_v36, %v2042_v35 }
 0x16c   : > { %1689 = vst [vmem:[%s2470_s29 + $0xa0] sm:$0xff] %v1625_v38  ;;  %v2044_v38 = vld [vmem:[%s2476_s11 + $0x168] sm:$0xf0] }
 0x16e   : > { %v1328_v43 = vpop.f32.mrf.mxu2 }
 0x16f   : > { %v1497_v45 = vpop.f32.mrf.mxu3  ;;  %v993_v46 = vpop.f32.mrf.mxu0 }
 0x170   : > { %v1498_v49 = vadd.f32 %v1497_v45, %v1328_v43  ;;  %v1162_v50 = vpop.f32.mrf.mxu1  ;;  %v2047_v43 = vor.u32 %v2297_v37, %v2044_v38 }
 0x171   : > { %v1163_v52 = vadd.f32 %v1162_v50, %v993_v46 }
 0x172   : > { %v1626_v51 = vpack.c.bf16 %v1498_v49, %v1160_v48  ;;  %1032 = vmatmul.bf16.gmra.mxu0 %v2019_v44 }
 0x173   : > { %1201 = vmatmul.bf16.gmra.mxu1 %v2023_v47  ;;  %1370 = vmatmul.bf16.gmra.mxu2 %v2019_v44 }
 0x174   : > { %1690 = vst [vmem:[%s2470_s29 + $0xa8] sm:$0xff] %v1626_v51  ;;  %1539 = vmatmul.bf16.gmra.mxu3 %v2023_v47 }
 0x176   : > { %v1331_v53 = vpop.f32.mrf.mxu2 }
 0x177   : > { %v1500_v54 = vpop.f32.mrf.mxu3  ;;  %v995_v55 = vpop.f32.mrf.mxu0 }
 0x178   : > { %v1501_v56 = vadd.f32 %v1500_v54, %v1331_v53  ;;  %v1164_v57 = vpop.f32.mrf.mxu1 }
 0x179   : > { %v1165_v4 = vadd.f32 %v1164_v57, %v995_v55  ;;  %v2050_v55 = vld [vmem:[%s2476_s11 + $0x170] sm:$0xf]  ;;  %v2299_v57 = vld [vmem:[%s2476_s11 + $0x174] sm:$0xf] }
 0x17a   : > { %v1627_v58 = vpack.c.bf16 %v1501_v56, %v1163_v52  ;;  %v2300_v56 = vld [vmem:[%s2476_s11 + $0x174] sm:$0xf0] }
 0x17b   : > { %v2051_v60 = vor.u32 %v2300_v56, %v2050_v55 }
 0x17c   : > { %1691 = vst [vmem:[%s2470_s29 + $0xb0] sm:$0xff] %v1627_v58  ;;  %v2052_v58 = vld [vmem:[%s2476_s11 + $0x178] sm:$0xf0] }
 0x17e   : > { %v1333_v63 = vpop.f32.mrf.mxu2 }
 0x17f   : > { %v1502_v1 = vpop.f32.mrf.mxu3  ;;  %v998_v2 = vpop.f32.mrf.mxu0 }
 0x180   : > { %v1503_v5 = vadd.f32 %v1502_v1, %v1333_v63  ;;  %v1167_v6 = vpop.f32.mrf.mxu1  ;;  %v2055_v63 = vor.u32 %v2299_v57, %v2052_v58 }
 0x181   : > { %v1168_v8 = vadd.f32 %v1167_v6, %v998_v2 }
 0x182   : > { %v1628_v7 = vpack.c.bf16 %v1503_v5, %v1165_v4  ;;  %1037 = vmatmul.bf16.gmra.mxu0 %v2027_v0 }
 0x183   : > { %1206 = vmatmul.bf16.gmra.mxu1 %v2031_v3  ;;  %1375 = vmatmul.bf16.gmra.mxu2 %v2027_v0 }
 0x184   : > { %1692 = vst [vmem:[%s2470_s29 + $0xb8] sm:$0xff] %v1628_v7  ;;  %1544 = vmatmul.bf16.gmra.mxu3 %v2031_v3 }
 0x186   : > { %v1336_v9 = vpop.f32.mrf.mxu2 }
 0x187   : > { %v1505_v10 = vpop.f32.mrf.mxu3  ;;  %v1000_v11 = vpop.f32.mrf.mxu0 }
 0x188   : > { %v1506_v12 = vadd.f32 %v1505_v10, %v1336_v9  ;;  %v1169_v13 = vpop.f32.mrf.mxu1 }
 0x189   : > { %v1170_v24 = vadd.f32 %v1169_v13, %v1000_v11  ;;  %v2058_v11 = vld [vmem:[%s2476_s11 + $0x180] sm:$0xf]  ;;  %v2301_v13 = vld [vmem:[%s2476_s11 + $0x184] sm:$0xf] }
 0x18a   : > { %v1629_v14 = vpack.c.bf16 %v1506_v12, %v1168_v8  ;;  %v2302_v12 = vld [vmem:[%s2476_s11 + $0x184] sm:$0xf0] }
 0x18b   : > { %v2059_v16 = vor.u32 %v2302_v12, %v2058_v11 }
 0x18c   : > { %1693 = vst [vmem:[%s2470_s29 + $0xc0] sm:$0xff] %v1629_v14  ;;  %v2060_v14 = vld [vmem:[%s2476_s11 + $0x188] sm:$0xf0] }
 0x18e   : > { %v1338_v19 = vpop.f32.mrf.mxu2 }
 0x18f   : > { %v1507_v21 = vpop.f32.mrf.mxu3  ;;  %v1003_v22 = vpop.f32.mrf.mxu0 }
 0x190   : > { %v1508_v25 = vadd.f32 %v1507_v21, %v1338_v19  ;;  %v1172_v26 = vpop.f32.mrf.mxu1  ;;  %v2063_v19 = vor.u32 %v2301_v13, %v2060_v14 }
 0x191   : > { %v1173_v28 = vadd.f32 %v1172_v26, %v1003_v22 }
 0x192   : > { %v1630_v27 = vpack.c.bf16 %v1508_v25, %v1170_v24  ;;  %1042 = vmatmul.bf16.gmra.mxu0 %v2035_v20 }
 0x193   : > { %1211 = vmatmul.bf16.gmra.mxu1 %v2039_v23  ;;  %1380 = vmatmul.bf16.gmra.mxu2 %v2035_v20 }
 0x194   : > { %1694 = vst [vmem:[%s2470_s29 + $0xc8] sm:$0xff] %v1630_v27  ;;  %1549 = vmatmul.bf16.gmra.mxu3 %v2039_v23 }
 0x196   : > { %v1341_v29 = vpop.f32.mrf.mxu2 }
 0x197   : > { %v1510_v30 = vpop.f32.mrf.mxu3  ;;  %v1005_v31 = vpop.f32.mrf.mxu0 }
 0x198   : > { %v1511_v32 = vadd.f32 %v1510_v30, %v1341_v29  ;;  %v1174_v33 = vpop.f32.mrf.mxu1 }
 0x199   : > { %v1175_v44 = vadd.f32 %v1174_v33, %v1005_v31  ;;  %v2066_v31 = vld [vmem:[%s2476_s11 + $0x190] sm:$0xf]  ;;  %v2303_v33 = vld [vmem:[%s2476_s11 + $0x194] sm:$0xf] }
 0x19a   : > { %v1631_v34 = vpack.c.bf16 %v1511_v32, %v1173_v28  ;;  %v2304_v32 = vld [vmem:[%s2476_s11 + $0x194] sm:$0xf0] }
 0x19b   : > { %v2067_v36 = vor.u32 %v2304_v32, %v2066_v31 }
 0x19c   : > { %1695 = vst [vmem:[%s2470_s29 + $0xd0] sm:$0xff] %v1631_v34  ;;  %v2068_v34 = vld [vmem:[%s2476_s11 + $0x198] sm:$0xf0] }
 0x19e   : > { %v1343_v39 = vpop.f32.mrf.mxu2 }
 0x19f   : > { %v1512_v41 = vpop.f32.mrf.mxu3  ;;  %v1008_v42 = vpop.f32.mrf.mxu0 }
 0x1a0   : > { %v1513_v45 = vadd.f32 %v1512_v41, %v1343_v39  ;;  %v1177_v46 = vpop.f32.mrf.mxu1  ;;  %v2071_v39 = vor.u32 %v2303_v33, %v2068_v34 }
 0x1a1   : > { %v1178_v48 = vadd.f32 %v1177_v46, %v1008_v42 }
 0x1a2   : > { %v1632_v47 = vpack.c.bf16 %v1513_v45, %v1175_v44  ;;  %1047 = vmatmul.bf16.gmra.mxu0 %v2043_v40 }
 0x1a3   : > { %1216 = vmatmul.bf16.gmra.mxu1 %v2047_v43  ;;  %1385 = vmatmul.bf16.gmra.mxu2 %v2043_v40 }
 0x1a4   : > { %1696 = vst [vmem:[%s2470_s29 + $0xd8] sm:$0xff] %v1632_v47  ;;  %1554 = vmatmul.bf16.gmra.mxu3 %v2047_v43 }
 0x1a6   : > { %v1346_v49 = vpop.f32.mrf.mxu2 }
 0x1a7   : > { %v1515_v50 = vpop.f32.mrf.mxu3  ;;  %v1010_v51 = vpop.f32.mrf.mxu0 }
 0x1a8   : > { %v1516_v52 = vadd.f32 %v1515_v50, %v1346_v49  ;;  %v1179_v53 = vpop.f32.mrf.mxu1 }
 0x1a9   : > { %v1180_v0 = vadd.f32 %v1179_v53, %v1010_v51  ;;  %v2074_v51 = vld [vmem:[%s2476_s11 + $0x1a0] sm:$0xf]  ;;  %v2305_v53 = vld [vmem:[%s2476_s11 + $0x1a4] sm:$0xf] }
 0x1aa   : > { %v1633_v54 = vpack.c.bf16 %v1516_v52, %v1178_v48  ;;  %v2306_v52 = vld [vmem:[%s2476_s11 + $0x1a4] sm:$0xf0] }
 0x1ab   : > { %v2075_v56 = vor.u32 %v2306_v52, %v2074_v51 }
 0x1ac   : > { %1697 = vst [vmem:[%s2470_s29 + $0xe0] sm:$0xff] %v1633_v54  ;;  %v2076_v54 = vld [vmem:[%s2476_s11 + $0x1a8] sm:$0xf0] }
 0x1ae   : > { %v1348_v59 = vpop.f32.mrf.mxu2 }
 0x1af   : > { %v1517_v61 = vpop.f32.mrf.mxu3  ;;  %v1013_v62 = vpop.f32.mrf.mxu0 }
 0x1b0   : > { %v1518_v1 = vadd.f32 %v1517_v61, %v1348_v59  ;;  %v1182_v2 = vpop.f32.mrf.mxu1  ;;  %v2079_v59 = vor.u32 %v2305_v53, %v2076_v54 }
 0x1b1   : > { %v1183_v4 = vadd.f32 %v1182_v2, %v1013_v62 }
 0x1b2   : > { %v1634_v3 = vpack.c.bf16 %v1518_v1, %v1180_v0  ;;  %1052 = vmatmul.bf16.gmra.mxu0 %v2051_v60 }
 0x1b3   : > { %1221 = vmatmul.bf16.gmra.mxu1 %v2055_v63  ;;  %1390 = vmatmul.bf16.gmra.mxu2 %v2051_v60 }
 0x1b4   : > { %1698 = vst [vmem:[%s2470_s29 + $0xe8] sm:$0xff] %v1634_v3  ;;  %1559 = vmatmul.bf16.gmra.mxu3 %v2055_v63 }
 0x1b6   : > { %v1351_v5 = vpop.f32.mrf.mxu2 }
 0x1b7   : > { %v1520_v6 = vpop.f32.mrf.mxu3  ;;  %v1015_v7 = vpop.f32.mrf.mxu0 }
 0x1b8   : > { %v1521_v8 = vadd.f32 %v1520_v6, %v1351_v5  ;;  %v1184_v9 = vpop.f32.mrf.mxu1 }
 0x1b9   : > { %v1185_v20 = vadd.f32 %v1184_v9, %v1015_v7  ;;  %v2082_v7 = vld [vmem:[%s2476_s11 + $0x1b0] sm:$0xf]  ;;  %v2307_v9 = vld [vmem:[%s2476_s11 + $0x1b4] sm:$0xf] }
 0x1ba   : > { %v1635_v10 = vpack.c.bf16 %v1521_v8, %v1183_v4  ;;  %v2308_v8 = vld [vmem:[%s2476_s11 + $0x1b4] sm:$0xf0] }
 0x1bb   : > { %v2083_v12 = vor.u32 %v2308_v8, %v2082_v7 }
 0x1bc   : > { %1699 = vst [vmem:[%s2470_s29 + $0xf0] sm:$0xff] %v1635_v10  ;;  %v2084_v10 = vld [vmem:[%s2476_s11 + $0x1b8] sm:$0xf0] }
 0x1be   : > { %v1353_v15 = vpop.f32.mrf.mxu2 }
 0x1bf   : > { %v1522_v17 = vpop.f32.mrf.mxu3  ;;  %v1018_v18 = vpop.f32.mrf.mxu0 }
 0x1c0   : > { %v1523_v21 = vadd.f32 %v1522_v17, %v1353_v15  ;;  %v1187_v22 = vpop.f32.mrf.mxu1  ;;  %v2087_v15 = vor.u32 %v2307_v9, %v2084_v10 }
 0x1c1   : > { %v1188_v24 = vadd.f32 %v1187_v22, %v1018_v18 }
 0x1c2   : > { %v1636_v23 = vpack.c.bf16 %v1523_v21, %v1185_v20  ;;  %1057 = vmatmul.bf16.gmra.mxu0 %v2059_v16 }
 0x1c3   : > { %1226 = vmatmul.bf16.gmra.mxu1 %v2063_v19  ;;  %1395 = vmatmul.bf16.gmra.mxu2 %v2059_v16 }
 0x1c4   : > { %1700 = vst [vmem:[%s2470_s29 + $0xf8] sm:$0xff] %v1636_v23  ;;  %1564 = vmatmul.bf16.gmra.mxu3 %v2063_v19 }
 0x1c6   : > { %v1356_v25 = vpop.f32.mrf.mxu2 }
 0x1c7   : > { %v1525_v26 = vpop.f32.mrf.mxu3  ;;  %v1020_v27 = vpop.f32.mrf.mxu0 }
 0x1c8   : > { %v1526_v28 = vadd.f32 %v1525_v26, %v1356_v25  ;;  %v1189_v29 = vpop.f32.mrf.mxu1 }
 0x1c9   : > { %v1190_v40 = vadd.f32 %v1189_v29, %v1020_v27  ;;  %v2090_v27 = vld [vmem:[%s2476_s11 + $0x1c0] sm:$0xf]  ;;  %v2309_v29 = vld [vmem:[%s2476_s11 + $0x1c4] sm:$0xf] }
 0x1ca   : > { %v1637_v30 = vpack.c.bf16 %v1526_v28, %v1188_v24  ;;  %v2310_v28 = vld [vmem:[%s2476_s11 + $0x1c4] sm:$0xf0] }
 0x1cb   : > { %v2091_v32 = vor.u32 %v2310_v28, %v2090_v27 }
 0x1cc   : > { %1701 = vst [vmem:[%s2470_s29 + $0x100] sm:$0xff] %v1637_v30  ;;  %v2092_v30 = vld [vmem:[%s2476_s11 + $0x1c8] sm:$0xf0] }
 0x1ce   : > { %v1358_v35 = vpop.f32.mrf.mxu2 }
 0x1cf   : > { %v1527_v37 = vpop.f32.mrf.mxu3  ;;  %v1023_v38 = vpop.f32.mrf.mxu0 }
 0x1d0   : > { %v1528_v41 = vadd.f32 %v1527_v37, %v1358_v35  ;;  %v1192_v42 = vpop.f32.mrf.mxu1  ;;  %v2095_v35 = vor.u32 %v2309_v29, %v2092_v30 }
 0x1d1   : > { %v1193_v44 = vadd.f32 %v1192_v42, %v1023_v38 }
 0x1d2   : > { %v1638_v43 = vpack.c.bf16 %v1528_v41, %v1190_v40  ;;  %1062 = vmatmul.bf16.gmra.mxu0 %v2067_v36 }
 0x1d3   : > { %1231 = vmatmul.bf16.gmra.mxu1 %v2071_v39  ;;  %1400 = vmatmul.bf16.gmra.mxu2 %v2067_v36 }
 0x1d4   : > { %1702 = vst [vmem:[%s2470_s29 + $0x108] sm:$0xff] %v1638_v43  ;;  %1569 = vmatmul.bf16.gmra.mxu3 %v2071_v39 }
 0x1d6   : > { %v1361_v45 = vpop.f32.mrf.mxu2 }
 0x1d7   : > { %v1530_v46 = vpop.f32.mrf.mxu3  ;;  %v1025_v47 = vpop.f32.mrf.mxu0 }
 0x1d8   : > { %v1531_v48 = vadd.f32 %v1530_v46, %v1361_v45  ;;  %v1194_v49 = vpop.f32.mrf.mxu1 }
 0x1d9   : > { %v1195_v60 = vadd.f32 %v1194_v49, %v1025_v47  ;;  %v2098_v47 = vld [vmem:[%s2476_s11 + $0x1d0] sm:$0xf]  ;;  %v2311_v49 = vld [vmem:[%s2476_s11 + $0x1d4] sm:$0xf] }
 0x1da   : > { %v1639_v50 = vpack.c.bf16 %v1531_v48, %v1193_v44  ;;  %v2312_v48 = vld [vmem:[%s2476_s11 + $0x1d4] sm:$0xf0] }
 0x1db   : > { %v2099_v52 = vor.u32 %v2312_v48, %v2098_v47 }
 0x1dc   : > { %1703 = vst [vmem:[%s2470_s29 + $0x110] sm:$0xff] %v1639_v50  ;;  %v2100_v50 = vld [vmem:[%s2476_s11 + $0x1d8] sm:$0xf0] }
 0x1de   : > { %v1363_v55 = vpop.f32.mrf.mxu2 }
 0x1df   : > { %v1532_v57 = vpop.f32.mrf.mxu3  ;;  %v1028_v58 = vpop.f32.mrf.mxu0 }
 0x1e0   : > { %v1533_v61 = vadd.f32 %v1532_v57, %v1363_v55  ;;  %v1197_v62 = vpop.f32.mrf.mxu1  ;;  %v2103_v55 = vor.u32 %v2311_v49, %v2100_v50 }
 0x1e1   : > { %v1198_v0 = vadd.f32 %v1197_v62, %v1028_v58 }
 0x1e2   : > { %v1640_v63 = vpack.c.bf16 %v1533_v61, %v1195_v60  ;;  %1067 = vmatmul.bf16.gmra.mxu0 %v2075_v56 }
 0x1e3   : > { %1236 = vmatmul.bf16.gmra.mxu1 %v2079_v59  ;;  %1405 = vmatmul.bf16.gmra.mxu2 %v2075_v56 }
 0x1e4   : > { %1704 = vst [vmem:[%s2470_s29 + $0x118] sm:$0xff] %v1640_v63  ;;  %1574 = vmatmul.bf16.gmra.mxu3 %v2079_v59 }
 0x1e6   : > { %v1366_v1 = vpop.f32.mrf.mxu2 }
 0x1e7   : > { %v1535_v2 = vpop.f32.mrf.mxu3  ;;  %v1030_v3 = vpop.f32.mrf.mxu0 }
 0x1e8   : > { %v1536_v4 = vadd.f32 %v1535_v2, %v1366_v1  ;;  %v1199_v5 = vpop.f32.mrf.mxu1 }
 0x1e9   : > { %v1200_v16 = vadd.f32 %v1199_v5, %v1030_v3  ;;  %v2106_v3 = vld [vmem:[%s2476_s11 + $0x1e0] sm:$0xf]  ;;  %v2313_v5 = vld [vmem:[%s2476_s11 + $0x1e4] sm:$0xf] }
 0x1ea   : > { %v1641_v6 = vpack.c.bf16 %v1536_v4, %v1198_v0  ;;  %v2314_v4 = vld [vmem:[%s2476_s11 + $0x1e4] sm:$0xf0] }
 0x1eb   : > { %v2107_v8 = vor.u32 %v2314_v4, %v2106_v3 }
 0x1ec   : > { %1705 = vst [vmem:[%s2470_s29 + $0x120] sm:$0xff] %v1641_v6  ;;  %v2108_v6 = vld [vmem:[%s2476_s11 + $0x1e8] sm:$0xf0] }
 0x1ee   : > { %v1368_v11 = vpop.f32.mrf.mxu2 }
 0x1ef   : > { %v1537_v13 = vpop.f32.mrf.mxu3  ;;  %v1033_v14 = vpop.f32.mrf.mxu0 }
 0x1f0   : > { %v1538_v17 = vadd.f32 %v1537_v13, %v1368_v11  ;;  %v1202_v18 = vpop.f32.mrf.mxu1  ;;  %v2111_v11 = vor.u32 %v2313_v5, %v2108_v6 }
 0x1f1   : > { %v1203_v20 = vadd.f32 %v1202_v18, %v1033_v14 }
 0x1f2   : > { %v1642_v19 = vpack.c.bf16 %v1538_v17, %v1200_v16  ;;  %1072 = vmatmul.bf16.gmra.mxu0 %v2083_v12 }
 0x1f3   : > { %1241 = vmatmul.bf16.gmra.mxu1 %v2087_v15  ;;  %1410 = vmatmul.bf16.gmra.mxu2 %v2083_v12 }
 0x1f4   : > { %1706 = vst [vmem:[%s2470_s29 + $0x128] sm:$0xff] %v1642_v19  ;;  %1579 = vmatmul.bf16.gmra.mxu3 %v2087_v15 }
 0x1f6   : > { %v1371_v21 = vpop.f32.mrf.mxu2 }
 0x1f7   : > { %v1540_v22 = vpop.f32.mrf.mxu3  ;;  %v1035_v23 = vpop.f32.mrf.mxu0 }
 0x1f8   : > { %v1541_v24 = vadd.f32 %v1540_v22, %v1371_v21  ;;  %v1204_v25 = vpop.f32.mrf.mxu1 }
 0x1f9   : > { %v1205_v36 = vadd.f32 %v1204_v25, %v1035_v23  ;;  %v2114_v23 = vld [vmem:[%s2476_s11 + $0x1f0] sm:$0xf]  ;;  %v2315_v25 = vld [vmem:[%s2476_s11 + $0x1f4] sm:$0xf] }
 0x1fa   : > { %v1643_v26 = vpack.c.bf16 %v1541_v24, %v1203_v20  ;;  %v2316_v24 = vld [vmem:[%s2476_s11 + $0x1f4] sm:$0xf0] }
 0x1fb   : > { %v2115_v28 = vor.u32 %v2316_v24, %v2114_v23 }
 0x1fc   : > { %1707 = vst [vmem:[%s2470_s29 + $0x130] sm:$0xff] %v1643_v26  ;;  %v2116_v26 = vld [vmem:[%s2476_s11 + $0x1f8] sm:$0xf0] }
 0x1fe   : > { %v1373_v31 = vpop.f32.mrf.mxu2 }
 0x1ff   : > { %v1542_v33 = vpop.f32.mrf.mxu3  ;;  %v1038_v34 = vpop.f32.mrf.mxu0 }
 0x200   : > { %v1543_v37 = vadd.f32 %v1542_v33, %v1373_v31  ;;  %v1207_v38 = vpop.f32.mrf.mxu1  ;;  %v2119_v31 = vor.u32 %v2315_v25, %v2116_v26 }
 0x201   : > { %v1208_v40 = vadd.f32 %v1207_v38, %v1038_v34 }
 0x202   : > { %v1644_v39 = vpack.c.bf16 %v1543_v37, %v1205_v36  ;;  %1077 = vmatmul.bf16.gmra.mxu0 %v2091_v32 }
 0x203   : > { %1246 = vmatmul.bf16.gmra.mxu1 %v2095_v35  ;;  %1415 = vmatmul.bf16.gmra.mxu2 %v2091_v32 }
 0x204   : > { %1708 = vst [vmem:[%s2470_s29 + $0x138] sm:$0xff] %v1644_v39  ;;  %1584 = vmatmul.bf16.gmra.mxu3 %v2095_v35 }
 0x206   : > { %v1376_v41 = vpop.f32.mrf.mxu2 }
 0x207   : > { %v1545_v42 = vpop.f32.mrf.mxu3  ;;  %v1040_v43 = vpop.f32.mrf.mxu0 }
 0x208   : > { %v1546_v44 = vadd.f32 %v1545_v42, %v1376_v41  ;;  %v1209_v45 = vpop.f32.mrf.mxu1 }
 0x209   : > { %v1210_v56 = vadd.f32 %v1209_v45, %v1040_v43 }
 0x20a   : > { %v1645_v46 = vpack.c.bf16 %v1546_v44, %v1208_v40 }
 0x20c   : > { %1709 = vst [vmem:[%s2470_s29 + $0x140] sm:$0xff] %v1645_v46 }
 0x20e   : > { %v1378_v51 = vpop.f32.mrf.mxu2 }
 0x20f   : > { %v1547_v53 = vpop.f32.mrf.mxu3  ;;  %v1043_v54 = vpop.f32.mrf.mxu0 }
 0x210   : > { %v1548_v57 = vadd.f32 %v1547_v53, %v1378_v51  ;;  %v1212_v58 = vpop.f32.mrf.mxu1 }
 0x211   : > { %v1213_v60 = vadd.f32 %v1212_v58, %v1043_v54 }
 0x212   : > { %v1646_v59 = vpack.c.bf16 %v1548_v57, %v1210_v56  ;;  %1082 = vmatmul.bf16.gmra.mxu0 %v2099_v52 }
 0x213   : > { %1251 = vmatmul.bf16.gmra.mxu1 %v2103_v55  ;;  %1420 = vmatmul.bf16.gmra.mxu2 %v2099_v52 }
 0x214   : > { %1710 = vst [vmem:[%s2470_s29 + $0x148] sm:$0xff] %v1646_v59  ;;  %1589 = vmatmul.bf16.gmra.mxu3 %v2103_v55 }
 0x216   : > { %v1381_v61 = vpop.f32.mrf.mxu2 }
 0x217   : > { %v1550_v62 = vpop.f32.mrf.mxu3  ;;  %v1045_v63 = vpop.f32.mrf.mxu0 }
 0x218   : > { %v1551_v0 = vadd.f32 %v1550_v62, %v1381_v61  ;;  %v1214_v1 = vpop.f32.mrf.mxu1 }
 0x219   : > { %v1215_v12 = vadd.f32 %v1214_v1, %v1045_v63 }
 0x21a   : > { %v1647_v2 = vpack.c.bf16 %v1551_v0, %v1213_v60 }
 0x21c   : > { %1711 = vst [vmem:[%s2470_s29 + $0x150] sm:$0xff] %v1647_v2 }
 0x21e   : > { %v1383_v7 = vpop.f32.mrf.mxu2 }
 0x21f   : > { %v1552_v9 = vpop.f32.mrf.mxu3  ;;  %v1048_v10 = vpop.f32.mrf.mxu0 }
 0x220   : > { %v1553_v13 = vadd.f32 %v1552_v9, %v1383_v7  ;;  %v1217_v14 = vpop.f32.mrf.mxu1 }
 0x221   : > { %v1218_v16 = vadd.f32 %v1217_v14, %v1048_v10 }
 0x222   : > { %v1648_v15 = vpack.c.bf16 %v1553_v13, %v1215_v12  ;;  %1087 = vmatmul.bf16.gmra.mxu0 %v2107_v8 }
 0x223   : > { %1256 = vmatmul.bf16.gmra.mxu1 %v2111_v11  ;;  %1425 = vmatmul.bf16.gmra.mxu2 %v2107_v8 }
 0x224   : > { %1712 = vst [vmem:[%s2470_s29 + $0x158] sm:$0xff] %v1648_v15  ;;  %1594 = vmatmul.bf16.gmra.mxu3 %v2111_v11 }
 0x226   : > { %v1386_v17 = vpop.f32.mrf.mxu2 }
 0x227   : > { %v1555_v18 = vpop.f32.mrf.mxu3  ;;  %v1050_v19 = vpop.f32.mrf.mxu0 }
 0x228   : > { %v1556_v20 = vadd.f32 %v1555_v18, %v1386_v17  ;;  %v1219_v21 = vpop.f32.mrf.mxu1 }
 0x229   : > { %v1220_v32 = vadd.f32 %v1219_v21, %v1050_v19 }
 0x22a   : > { %v1649_v22 = vpack.c.bf16 %v1556_v20, %v1218_v16 }
 0x22c   : > { %1713 = vst [vmem:[%s2470_s29 + $0x160] sm:$0xff] %v1649_v22 }
 0x22e   : > { %v1388_v27 = vpop.f32.mrf.mxu2 }
 0x22f   : > { %v1557_v29 = vpop.f32.mrf.mxu3  ;;  %v1053_v30 = vpop.f32.mrf.mxu0 }
 0x230   : > { %v1558_v33 = vadd.f32 %v1557_v29, %v1388_v27  ;;  %v1222_v34 = vpop.f32.mrf.mxu1 }
 0x231   : > { %v1223_v36 = vadd.f32 %v1222_v34, %v1053_v30 }
 0x232   : > { %v1650_v35 = vpack.c.bf16 %v1558_v33, %v1220_v32  ;;  %1092 = vmatmul.bf16.gmra.mxu0 %v2115_v28 }
 0x233   : > { %1261 = vmatmul.bf16.gmra.mxu1 %v2119_v31  ;;  %1430 = vmatmul.bf16.gmra.mxu2 %v2115_v28 }
 0x234   : > { %1714 = vst [vmem:[%s2470_s29 + $0x168] sm:$0xff] %v1650_v35  ;;  %1599 = vmatmul.bf16.gmra.mxu3 %v2119_v31 }
 0x236   : > { %v1391_v37 = vpop.f32.mrf.mxu2 }
 0x237   : > { %v1560_v38 = vpop.f32.mrf.mxu3  ;;  %v1055_v39 = vpop.f32.mrf.mxu0 }
 0x238   : > { %v1561_v40 = vadd.f32 %v1560_v38, %v1391_v37  ;;  %v1224_v41 = vpop.f32.mrf.mxu1 }
 0x239   : > { %v1225_v46 = vadd.f32 %v1224_v41, %v1055_v39 }
 0x23a   : > { %v1651_v42 = vpack.c.bf16 %v1561_v40, %v1223_v36 }
 0x23c   : > { %1715 = vst [vmem:[%s2470_s29 + $0x170] sm:$0xff] %v1651_v42 }
 0x23e   : > { %v1393_v43 = vpop.f32.mrf.mxu2 }
 0x23f   : > { %v1562_v44 = vpop.f32.mrf.mxu3  ;;  %v1058_v45 = vpop.f32.mrf.mxu0 }
 0x240   : > { %v1563_v47 = vadd.f32 %v1562_v44, %v1393_v43  ;;  %v1227_v48 = vpop.f32.mrf.mxu1 }
 0x241   : > { %v1228_v50 = vadd.f32 %v1227_v48, %v1058_v45 }
 0x242   : > { %v1652_v49 = vpack.c.bf16 %v1563_v47, %v1225_v46 }
 0x244   : > { %1716 = vst [vmem:[%s2470_s29 + $0x178] sm:$0xff] %v1652_v49 }
 0x246   : > { %v1396_v51 = vpop.f32.mrf.mxu2 }
 0x247   : > { %v1565_v52 = vpop.f32.mrf.mxu3  ;;  %v1060_v53 = vpop.f32.mrf.mxu0 }
 0x248   : > { %v1566_v54 = vadd.f32 %v1565_v52, %v1396_v51  ;;  %v1229_v55 = vpop.f32.mrf.mxu1 }
 0x249   : > { %v1230_v60 = vadd.f32 %v1229_v55, %v1060_v53 }
 0x24a   : > { %v1653_v56 = vpack.c.bf16 %v1566_v54, %v1228_v50 }
 0x24c   : > { %1717 = vst [vmem:[%s2470_s29 + $0x180] sm:$0xff] %v1653_v56 }
 0x24e   : > { %v1398_v57 = vpop.f32.mrf.mxu2 }
 0x24f   : > { %v1567_v58 = vpop.f32.mrf.mxu3  ;;  %v1063_v59 = vpop.f32.mrf.mxu0 }
 0x250   : > { %v1568_v61 = vadd.f32 %v1567_v58, %v1398_v57  ;;  %v1232_v62 = vpop.f32.mrf.mxu1 }
 0x251   : > { %v1233_v0 = vadd.f32 %v1232_v62, %v1063_v59 }
 0x252   : > { %v1654_v63 = vpack.c.bf16 %v1568_v61, %v1230_v60 }
 0x254   : > { %1718 = vst [vmem:[%s2470_s29 + $0x188] sm:$0xff] %v1654_v63 }
 0x256   : > { %v1401_v1 = vpop.f32.mrf.mxu2 }
 0x257   : > { %v1570_v2 = vpop.f32.mrf.mxu3  ;;  %v1065_v3 = vpop.f32.mrf.mxu0 }
 0x258   : > { %v1571_v4 = vadd.f32 %v1570_v2, %v1401_v1  ;;  %v1234_v5 = vpop.f32.mrf.mxu1 }
 0x259   : > { %v1235_v10 = vadd.f32 %v1234_v5, %v1065_v3 }
 0x25a   : > { %v1655_v6 = vpack.c.bf16 %v1571_v4, %v1233_v0 }
 0x25c   : > { %1719 = vst [vmem:[%s2470_s29 + $0x190] sm:$0xff] %v1655_v6 }
 0x25e   : > { %v1403_v7 = vpop.f32.mrf.mxu2 }
 0x25f   : > { %v1572_v8 = vpop.f32.mrf.mxu3  ;;  %v1068_v9 = vpop.f32.mrf.mxu0 }
 0x260   : > { %v1573_v11 = vadd.f32 %v1572_v8, %v1403_v7  ;;  %v1237_v12 = vpop.f32.mrf.mxu1 }
 0x261   : > { %v1238_v14 = vadd.f32 %v1237_v12, %v1068_v9 }
 0x262   : > { %v1656_v13 = vpack.c.bf16 %v1573_v11, %v1235_v10 }
 0x264   : > { %1720 = vst [vmem:[%s2470_s29 + $0x198] sm:$0xff] %v1656_v13 }
 0x266   : > { %v1406_v15 = vpop.f32.mrf.mxu2 }
 0x267   : > { %v1575_v16 = vpop.f32.mrf.mxu3  ;;  %v1070_v17 = vpop.f32.mrf.mxu0 }
 0x268   : > { %v1576_v18 = vadd.f32 %v1575_v16, %v1406_v15  ;;  %v1239_v19 = vpop.f32.mrf.mxu1 }
 0x269   : > { %v1240_v24 = vadd.f32 %v1239_v19, %v1070_v17 }
 0x26a   : > { %v1657_v20 = vpack.c.bf16 %v1576_v18, %v1238_v14 }
 0x26c   : > { %1721 = vst [vmem:[%s2470_s29 + $0x1a0] sm:$0xff] %v1657_v20 }
 0x26e   : > { %v1408_v21 = vpop.f32.mrf.mxu2 }
 0x26f   : > { %v1577_v22 = vpop.f32.mrf.mxu3  ;;  %v1073_v23 = vpop.f32.mrf.mxu0 }
 0x270   : > { %v1578_v25 = vadd.f32 %v1577_v22, %v1408_v21  ;;  %v1242_v26 = vpop.f32.mrf.mxu1 }
 0x271   : > { %v1243_v28 = vadd.f32 %v1242_v26, %v1073_v23 }
 0x272   : > { %v1658_v27 = vpack.c.bf16 %v1578_v25, %v1240_v24 }
 0x274   : > { %1722 = vst [vmem:[%s2470_s29 + $0x1a8] sm:$0xff] %v1658_v27 }
 0x276   : > { %v1411_v29 = vpop.f32.mrf.mxu2 }
 0x277   : > { %v1580_v30 = vpop.f32.mrf.mxu3  ;;  %v1075_v31 = vpop.f32.mrf.mxu0 }
 0x278   : > { %v1581_v32 = vadd.f32 %v1580_v30, %v1411_v29  ;;  %v1244_v33 = vpop.f32.mrf.mxu1 }
 0x279   : > { %v1245_v38 = vadd.f32 %v1244_v33, %v1075_v31 }
 0x27a   : > { %v1659_v34 = vpack.c.bf16 %v1581_v32, %v1243_v28 }
 0x27c   : > { %1723 = vst [vmem:[%s2470_s29 + $0x1b0] sm:$0xff] %v1659_v34 }
 0x27e   : > { %v1413_v35 = vpop.f32.mrf.mxu2 }
 0x27f   : > { %v1582_v36 = vpop.f32.mrf.mxu3  ;;  %v1078_v37 = vpop.f32.mrf.mxu0 }
 0x280   : > { %v1583_v39 = vadd.f32 %v1582_v36, %v1413_v35  ;;  %v1247_v40 = vpop.f32.mrf.mxu1 }
 0x281   : > { %v1248_v42 = vadd.f32 %v1247_v40, %v1078_v37 }
 0x282   : > { %v1660_v41 = vpack.c.bf16 %v1583_v39, %v1245_v38 }
 0x284   : > { %1724 = vst [vmem:[%s2470_s29 + $0x1b8] sm:$0xff] %v1660_v41 }
 0x286   : > { %v1416_v43 = vpop.f32.mrf.mxu2 }
 0x287   : > { %v1585_v44 = vpop.f32.mrf.mxu3  ;;  %v1080_v45 = vpop.f32.mrf.mxu0 }
 0x288   : > { %v1586_v46 = vadd.f32 %v1585_v44, %v1416_v43  ;;  %v1249_v47 = vpop.f32.mrf.mxu1 }
 0x289   : > { %v1250_v52 = vadd.f32 %v1249_v47, %v1080_v45 }
 0x28a   : > { %v1661_v48 = vpack.c.bf16 %v1586_v46, %v1248_v42 }
 0x28c   : > { %1725 = vst [vmem:[%s2470_s29 + $0x1c0] sm:$0xff] %v1661_v48 }
 0x28e   : > { %v1418_v49 = vpop.f32.mrf.mxu2 }
 0x28f   : > { %v1587_v50 = vpop.f32.mrf.mxu3  ;;  %v1083_v51 = vpop.f32.mrf.mxu0 }
 0x290   : > { %v1588_v53 = vadd.f32 %v1587_v50, %v1418_v49  ;;  %v1252_v54 = vpop.f32.mrf.mxu1 }
 0x291   : > { %v1253_v56 = vadd.f32 %v1252_v54, %v1083_v51 }
 0x292   : > { %v1662_v55 = vpack.c.bf16 %v1588_v53, %v1250_v52 }
 0x294   : > { %1726 = vst [vmem:[%s2470_s29 + $0x1c8] sm:$0xff] %v1662_v55 }
 0x296   : > { %v1421_v57 = vpop.f32.mrf.mxu2 }
 0x297   : > { %v1590_v58 = vpop.f32.mrf.mxu3  ;;  %v1085_v59 = vpop.f32.mrf.mxu0 }
 0x298   : > { %v1591_v60 = vadd.f32 %v1590_v58, %v1421_v57  ;;  %v1254_v61 = vpop.f32.mrf.mxu1 }
 0x299   : > { %v1255_v2 = vadd.f32 %v1254_v61, %v1085_v59 }
 0x29a   : > { %v1663_v62 = vpack.c.bf16 %v1591_v60, %v1253_v56 }
 0x29c   : > { %1727 = vst [vmem:[%s2470_s29 + $0x1d0] sm:$0xff] %v1663_v62 }
 0x29e   : > { %v1423_v63 = vpop.f32.mrf.mxu2 }
 0x29f   : > { %v1592_v0 = vpop.f32.mrf.mxu3  ;;  %v1088_v1 = vpop.f32.mrf.mxu0 }
 0x2a0   : > { %v1593_v3 = vadd.f32 %v1592_v0, %v1423_v63  ;;  %v1257_v4 = vpop.f32.mrf.mxu1 }
 0x2a1   : > { %v1258_v6 = vadd.f32 %v1257_v4, %v1088_v1 }
 0x2a2   : > { %v1664_v5 = vpack.c.bf16 %v1593_v3, %v1255_v2 }
 0x2a4   : > { %1728 = vst [vmem:[%s2470_s29 + $0x1d8] sm:$0xff] %v1664_v5 }
 0x2a6   : > { %v1426_v7 = vpop.f32.mrf.mxu2 }
 0x2a7   : > { %v1595_v8 = vpop.f32.mrf.mxu3  ;;  %v1090_v10 = vpop.f32.mrf.mxu0 }
 0x2a8   : > { %v1596_v9 = vadd.f32 %v1595_v8, %v1426_v7  ;;  %v1259_v11 = vpop.f32.mrf.mxu1 }
 0x2a9   : > { %v1260_v15 = vadd.f32 %v1259_v11, %v1090_v10 }
 0x2aa   : > { %v1665_v12 = vpack.c.bf16 %v1596_v9, %v1258_v6 }
 0x2ac   : > { %1729 = vst [vmem:[%s2470_s29 + $0x1e0] sm:$0xff] %v1665_v12 }
 0x2ae   : > { %v1428_v13 = vpop.f32.mrf.mxu2 }
 0x2af   : > { %v1597_v14 = vpop.f32.mrf.mxu3  ;;  %v1093_v18 = vpop.f32.mrf.mxu0 }
 0x2b0   : > { %v1598_v16 = vadd.f32 %v1597_v14, %v1428_v13  ;;  %v1262_v19 = vpop.f32.mrf.mxu1 }
 0x2b1   : > { %v1263_v20 = vadd.f32 %v1262_v19, %v1093_v18 }
 0x2b2   : > { %v1666_v17 = vpack.c.bf16 %v1598_v16, %v1260_v15 }
 0x2b4   : > { %1730 = vst [vmem:[%s2470_s29 + $0x1e8] sm:$0xff] %v1666_v17 }
 0x2b6   : > { %v1431_v21 = vpop.f32.mrf.mxu2 }
 0x2b7   : > { %v1600_v22 = vpop.f32.mrf.mxu3  ;;  %v1095_v25 = vpop.f32.mrf.mxu0 }
 0x2b8   : > { %v1601_v23 = vadd.f32 %v1600_v22, %v1431_v21  ;;  %v1264_v26 = vpop.f32.mrf.mxu1 }
 0x2b9   : > { %v1265_v29 = vadd.f32 %v1264_v26, %v1095_v25 }
 0x2ba   : > { %v1667_v24 = vpack.c.bf16 %v1601_v23, %v1263_v20 }
 0x2bc   : > { %1731 = vst [vmem:[%s2470_s29 + $0x1f0] sm:$0xff] %v1667_v24 }
 0x2be   : > { %v1433_v27 = vpop.f32.mrf.mxu2 }
 0x2bf   : > { %v1602_v28 = vpop.f32.mrf.mxu3 }
 0x2c0   : > { %v1603_v30 = vadd.f32 %v1602_v28, %v1433_v27 }
 0x2c2   : > { %v1668_v31 = vpack.c.bf16 %v1603_v30, %v1265_v29 }
 0x2c4   : > { %1732 = vst [vmem:[%s2470_s29 + $0x1f8] sm:$0xff] %v1668_v31 }
 0x2c5 PF: > { %s23_s23 = sadd.s32 1, %s2410_s23   ;;  %s2754_s21 = smov %s2406_s22 }
 0x2c6   : > { %p20_p9 = scmp.ge.s32.totalorder %s23_s23, 11   ;;  %s2755_s22 = smov %s2757_s0 }
 0x2c8   :  { %22 = sbr.rel (!%p20_p9) target bundleno = 8 (0x8), region = 65 }

</bundles_post_ra>
